<compile_context>
chip_gen: v7x
topology: tpu7x:2x2x1
jax: 0.10.0
libtpu: 0.0.40
codegen_flags: <defaults>
</compile_context>

<pallas_src>
import jax
import jax.numpy as jnp
from jax import lax
from jax.experimental import pallas as pl
from jax.experimental.pallas import tpu as pltpu

EPS = 1e-5
R = 3  # radius of the largest (7x7) kernel


def make_msf_kernel(W, Cp, HWp):
    """Kernel closure over static width, padded Cin and padded H*W."""

    def kernel(w_ref, b_ref, m_ref, x_ref, o_ref, col_ref):
        # w_ref  : (C4, 49*Cp)  bf16  fused, BN-scaled, lane-dense weights
        # b_ref  : (C4, 1)      f32   fused bias (conv bias + BN shift)
        # m_ref  : (49, 1, HWp) f32   per-tap 0/1 boundary masks
        # x_ref  : (Cp, HWp)    f32   one batch element, lane-dense
        # o_ref  : (C4, HWp)          output block
        # col_ref: (49*Cp, HWp) f32   im2col scratch (sublane-aligned blocks)
        x = x_ref[...]                                     # (Cp, HWp) f32

        # Build the im2col buffer: tap t occupies rows [t*Cp, (t+1)*Cp).
        t = 0
        for dh in range(-R, R + 1):
            for dw in range(-R, R + 1):
                s = dh * W + dw
                center = (dh == 0 and dw == 0)
                # src[:, p] == x[:, p + s]  (valid positions only; rest masked)
                src = x if center else pltpu.roll(x, (-s) % HWp, axis=1)
                if not center:
                    src = src * m_ref[t]                   # (1, HWp) broadcast
                col_ref[pl.ds(t * Cp, Cp), :] = src
                t += 1

        # Single fused MXU matmul: (C4, 49*Cp) x (49*Cp, HWp), bf16 operands,
        # f32 accumulation.
        col = col_ref[...].astype(jnp.bfloat16)
        acc = jnp.dot(w_ref[...], col, preferred_element_type=jnp.float32)

        o_ref[...] = jnp.maximum(acc + b_ref[...], 0.0).astype(o_ref.dtype)

    return kernel


def fold_params(params, cin_pad, eps=EPS):
    """Fold 4 convs + concat + eval-mode BN into (C4, 49*Cp) weights + bias."""
    w1, b1, w3, b3, w5, b5, w7, b7, gamma, beta, mean, var = params
    Cin = w1.shape[1]

    def pad7(w):  # (Cout, Cin, k, k) -> (Cout, Cin, 7, 7), centered
        p = (7 - w.shape[-1]) // 2
        return jnp.pad(w, ((0, 0), (0, 0), (p, p), (p, p)))

    w_cat = jnp.concatenate([pad7(w1), pad7(w3), pad7(w5), pad7(w7)], axis=0)
    b_cat = jnp.concatenate([b1, b3, b5, b7])                  # (C4,)
    C4 = w_cat.shape[0]

    scale = gamma / jnp.sqrt(var + eps)                        # (C4,)
    shift = beta - mean * scale

    w_scaled = w_cat * scale[:, None, None, None]              # (C4, Cin, 7, 7)
    w_scaled = jnp.pad(w_scaled, ((0, 0), (0, cin_pad - Cin), (0, 0), (0, 0)))
    # Lane-dense (C4, 49*Cp); column index = ((dh+3)*7 + (dw+3)) * Cp + c,
    # matching the kernel's tap loop / im2col row order.
    w_flat = w_scaled.transpose(0, 2, 3, 1).reshape(C4, 49 * cin_pad)
    w_flat = w_flat.astype(jnp.bfloat16)

    bias = (scale * b_cat + shift).astype(jnp.float32).reshape(C4, 1)
    return w_flat, bias


def build_masks(H, W, HWp):
    """(49, 1, HWp) f32 0/1 masks: tap (dh, dw) valid at flat position p."""
    p = jnp.arange(HWp, dtype=jnp.int32)
    row, col = p // W, p % W
    masks = []
    for dh in range(-R, R + 1):
        for dw in range(-R, R + 1):
            ok = ((row + dh >= 0) & (row + dh < H) &
                  (col + dw >= 0) & (col + dw < W))
            masks.append(ok)
    return jnp.stack(masks, axis=0).astype(jnp.float32).reshape(49, 1, HWp)


def multi_scale_fusion(x, params):
    B, Cin, H, W = x.shape
    Cout = params[0].shape[0]
    C4 = 4 * Cout
    HW = H * W
    HWp = ((HW + 127) // 128) * 128          # lane-dense output (mult. of 128)
    Cp = ((max(Cin, 8) + 7) // 8) * 8        # sublane-aligned im2col blocks
    K = 49 * Cp

    w_flat, bias = fold_params(params, Cp)
    masks = build_masks(H, W, HWp)

    x_flat = x.reshape(B, Cin, HW)           # lane-dense: H*W on the lane axis
    if Cp != Cin or HWp != HW:
        x_flat = jnp.pad(x_flat, ((0, 0), (0, Cp - Cin), (0, HWp - HW)))

    out_flat = pl.pallas_call(
        make_msf_kernel(W, Cp, HWp),
        out_shape=jax.ShapeDtypeStruct((B, C4, HWp), x.dtype),
        grid_spec=pltpu.PrefetchScalarGridSpec(
            num_scalar_prefetch=0,
            grid=(B,),
            in_specs=[
                pl.BlockSpec((C4, K), lambda b: (0, 0)),           # weights
                pl.BlockSpec((C4, 1), lambda b: (0, 0)),           # bias
                pl.BlockSpec((49, 1, HWp), lambda b: (0, 0, 0)),   # masks
                pl.BlockSpec((None, Cp, HWp), lambda b: (b, 0, 0)),  # x
            ],
            out_specs=pl.BlockSpec((None, C4, HWp), lambda b: (b, 0, 0)),
            scratch_shapes=[pltpu.VMEM((K, HWp), jnp.float32)],
        ),
        compiler_params=pltpu.CompilerParams(
            dimension_semantics=("parallel",)),
    )(w_flat, bias, masks, x_flat)

    return out_flat[:, :, :HW].reshape(B, C4, H, W)


def reference(x, params, eps=EPS):
    """Pure-JAX reference: 4 convs -> concat -> eval-mode BN -> ReLU (f32)."""
    w1, b1, w3, b3, w5, b5, w7, b7, gamma, beta, mean, var = params
    outs = []
    for w, b in ((w1, b1), (w3, b3), (w5, b5), (w7, b7)):
        r = (w.shape[-1] - 1) // 2
        y = lax.conv_general_dilated(
            x, w, window_strides=(1, 1), padding=((r, r), (r, r)),
            dimension_numbers=("NCHW", "OIHW", "NCHW"),
            precision=lax.Precision.HIGHEST)
        outs.append(y + b.reshape(1, -1, 1, 1))
    z = jnp.concatenate(outs, axis=1)
    scale = (gamma / jnp.sqrt(var + eps)).reshape(1, -1, 1, 1)
    shift = (beta - mean * gamma / jnp.sqrt(var + eps)).reshape(1, -1, 1, 1)
    return jnp.maximum(z * scale + shift, 0.0)


def init_params(key, cin, cout):
    ks = jax.random.split(key, 12)

    def conv_init(kw, kb, k):
        fan = cin * k * k
        bound = 1.0 / (fan ** 0.5)
        w = jax.random.uniform(kw, (cout, cin, k, k), jnp.float32, -bound, bound)
        b = jax.random.uniform(kb, (cout,), jnp.float32, -bound, bound)
        return w, b

    w1, b1 = conv_init(ks[0], ks[1], 1)
    w3, b3 = conv_init(ks[2], ks[3], 3)
    w5, b5 = conv_init(ks[4], ks[5], 5)
    w7, b7 = conv_init(ks[6], ks[7], 7)
    c4 = 4 * cout
    gamma = jax.random.uniform(ks[8], (c4,), jnp.float32, 0.5, 1.5)
    beta = jax.random.uniform(ks[9], (c4,), jnp.float32, -0.5, 0.5)
    mean = jax.random.normal(ks[10], (c4,), jnp.float32) * 0.1
    var = jax.random.uniform(ks[11], (c4,), jnp.float32, 0.5, 1.5)
    return (w1, b1, w3, b3, w5, b5, w7, b7, gamma, beta, mean, var)


if __name__ == "__main__":
    key = jax.random.PRNGKey(0)
    kx, kp = jax.random.split(key)

    B, Cin, Cout, H, W = 2, 4, 4, 16, 16
    x = jax.random.normal(kx, (B, Cin, H, W), jnp.float32)
    params = init_params(kp, Cin, Cout)

    out = multi_scale_fusion(x, params)
    out = jax.block_until_ready(out)

    ref = reference(x, params)
    assert out.shape == ref.shape == (B, 4 * Cout, H, W)
    max_err = float(jnp.max(jnp.abs(out - ref)))
    # Tolerance sized for bf16 MXU operands (intentional, per perf review) vs
    # the f32 HIGHEST-precision reference.  Real logic errors (wrong tap/mask/
    # roll direction/BN fold) are O(0.1 - 1) and would still trip this.
    assert jnp.allclose(out, ref, atol=2e-2, rtol=2e-2), max_err

    print("KERNEL_OK")
</pallas_src>

<mosaic_0001>
module attributes {stable_mosaic.version = 11 : i64} {
  func.func @kernel(%arg0: i32, %arg1: memref<16x392xbf16, #tpu.memory_space<vmem>>, %arg2: memref<16x1xf32, #tpu.memory_space<vmem>>, %arg3: memref<49x1x256xf32, #tpu.memory_space<vmem>>, %arg4: memref<1x8x256xf32, #tpu.memory_space<vmem>>, %arg5: memref<1x16x256xf32, #tpu.memory_space<vmem>>, %arg6: memref<392x256xf32, #tpu.memory_space<vmem>>) attributes {dimension_semantics = [#tpu.dimension_semantics<parallel>], iteration_bounds = array<i64: 2>, scalar_prefetch = 0 : i64, scratch_operands = 1 : i64, tpu.core_type = #tpu.core_type<tc>, window_params = [{pipeline_mode = #tpu.pipeline_mode<synchronous>, transform_indices = @transform_0, window_bounds = array<i64: 16, 392>}, {pipeline_mode = #tpu.pipeline_mode<synchronous>, transform_indices = @transform_1, window_bounds = array<i64: 16, 1>}, {pipeline_mode = #tpu.pipeline_mode<synchronous>, transform_indices = @transform_2, window_bounds = array<i64: 49, 1, 256>}, {transform_indices = @transform_3, window_bounds = array<i64: 1, 8, 256>}, {transform_indices = @transform_4, window_bounds = array<i64: 1, 16, 256>}]} {
    %c0 = arith.constant 0 : index
    %c0_0 = arith.constant 0 : index
    %c0_1 = arith.constant 0 : index
    %0 = vector.load %arg4[%c0, %c0_0, %c0_1] : memref<1x8x256xf32, #tpu.memory_space<vmem>>, vector<1x8x256xf32>
    %1 = vector.shape_cast %0 : vector<1x8x256xf32> to vector<8x256xf32>
    %c51_i32 = arith.constant 51 : i32
    %2 = tpu.dynamic_rotate %1 by %c51_i32 dim 1 : vector<8x256xf32>, i32 -> vector<8x256xf32>
    %c0_2 = arith.constant 0 : index
    %c0_3 = arith.constant 0 : index
    %c0_4 = arith.constant 0 : index
    %3 = vector.load %arg3[%c0_2, %c0_3, %c0_4] : memref<49x1x256xf32, #tpu.memory_space<vmem>>, vector<1x1x256xf32>
    %4 = vector.shape_cast %3 : vector<1x1x256xf32> to vector<1x256xf32>
    %5 = vector.broadcast %4 : vector<1x256xf32> to vector<8x256xf32>
    %6 = arith.mulf %2, %5 : vector<8x256xf32>
    %c0_5 = arith.constant 0 : index
    %c0_6 = arith.constant 0 : index
    %7 = vector.load %arg6[%c0_5, %c0_6] : memref<392x256xf32, #tpu.memory_space<vmem>>, vector<8x256xf32>
    tpu.vector_store %arg6[%c0_5, %c0_6], %6 {strides = array<i32>} : memref<392x256xf32, #tpu.memory_space<vmem>>, vector<8x256xf32>,
    %c50_i32 = arith.constant 50 : i32
    %8 = tpu.dynamic_rotate %1 by %c50_i32 dim 1 : vector<8x256xf32>, i32 -> vector<8x256xf32>
    %c1 = arith.constant 1 : index
    %c0_7 = arith.constant 0 : index
    %c0_8 = arith.constant 0 : index
    %9 = vector.load %arg3[%c1, %c0_7, %c0_8] : memref<49x1x256xf32, #tpu.memory_space<vmem>>, vector<1x1x256xf32>
    %10 = vector.shape_cast %9 : vector<1x1x256xf32> to vector<1x256xf32>
    %11 = vector.broadcast %10 : vector<1x256xf32> to vector<8x256xf32>
    %12 = arith.mulf %8, %11 : vector<8x256xf32>
    %c8 = arith.constant 8 : index
    %c0_9 = arith.constant 0 : index
    %13 = vector.load %arg6[%c8, %c0_9] : memref<392x256xf32, #tpu.memory_space<vmem>>, vector<8x256xf32>
    tpu.vector_store %arg6[%c8, %c0_9], %12 {strides = array<i32>} : memref<392x256xf32, #tpu.memory_space<vmem>>, vector<8x256xf32>,
    %c49_i32 = arith.constant 49 : i32
    %14 = tpu.dynamic_rotate %1 by %c49_i32 dim 1 : vector<8x256xf32>, i32 -> vector<8x256xf32>
    %c2 = arith.constant 2 : index
    %c0_10 = arith.constant 0 : index
    %c0_11 = arith.constant 0 : index
    %15 = vector.load %arg3[%c2, %c0_10, %c0_11] : memref<49x1x256xf32, #tpu.memory_space<vmem>>, vector<1x1x256xf32>
    %16 = vector.shape_cast %15 : vector<1x1x256xf32> to vector<1x256xf32>
    %17 = vector.broadcast %16 : vector<1x256xf32> to vector<8x256xf32>
    %18 = arith.mulf %14, %17 : vector<8x256xf32>
    %c16 = arith.constant 16 : index
    %c0_12 = arith.constant 0 : index
    %19 = vector.load %arg6[%c16, %c0_12] : memref<392x256xf32, #tpu.memory_space<vmem>>, vector<8x256xf32>
    tpu.vector_store %arg6[%c16, %c0_12], %18 {strides = array<i32>} : memref<392x256xf32, #tpu.memory_space<vmem>>, vector<8x256xf32>,
    %c48_i32 = arith.constant 48 : i32
    %20 = tpu.dynamic_rotate %1 by %c48_i32 dim 1 : vector<8x256xf32>, i32 -> vector<8x256xf32>
    %c3 = arith.constant 3 : index
    %c0_13 = arith.constant 0 : index
    %c0_14 = arith.constant 0 : index
    %21 = vector.load %arg3[%c3, %c0_13, %c0_14] : memref<49x1x256xf32, #tpu.memory_space<vmem>>, vector<1x1x256xf32>
    %22 = vector.shape_cast %21 : vector<1x1x256xf32> to vector<1x256xf32>
    %23 = vector.broadcast %22 : vector<1x256xf32> to vector<8x256xf32>
    %24 = arith.mulf %20, %23 : vector<8x256xf32>
    %c24 = arith.constant 24 : index
    %c0_15 = arith.constant 0 : index
    %25 = vector.load %arg6[%c24, %c0_15] : memref<392x256xf32, #tpu.memory_space<vmem>>, vector<8x256xf32>
    tpu.vector_store %arg6[%c24, %c0_15], %24 {strides = array<i32>} : memref<392x256xf32, #tpu.memory_space<vmem>>, vector<8x256xf32>,
    %c47_i32 = arith.constant 47 : i32
    %26 = tpu.dynamic_rotate %1 by %c47_i32 dim 1 : vector<8x256xf32>, i32 -> vector<8x256xf32>
    %c4 = arith.constant 4 : index
    %c0_16 = arith.constant 0 : index
    %c0_17 = arith.constant 0 : index
    %27 = vector.load %arg3[%c4, %c0_16, %c0_17] : memref<49x1x256xf32, #tpu.memory_space<vmem>>, vector<1x1x256xf32>
    %28 = vector.shape_cast %27 : vector<1x1x256xf32> to vector<1x256xf32>
    %29 = vector.broadcast %28 : vector<1x256xf32> to vector<8x256xf32>
    %30 = arith.mulf %26, %29 : vector<8x256xf32>
    %c32 = arith.constant 32 : index
    %c0_18 = arith.constant 0 : index
    %31 = vector.load %arg6[%c32, %c0_18] : memref<392x256xf32, #tpu.memory_space<vmem>>, vector<8x256xf32>
    tpu.vector_store %arg6[%c32, %c0_18], %30 {strides = array<i32>} : memref<392x256xf32, #tpu.memory_space<vmem>>, vector<8x256xf32>,
    %c46_i32 = arith.constant 46 : i32
    %32 = tpu.dynamic_rotate %1 by %c46_i32 dim 1 : vector<8x256xf32>, i32 -> vector<8x256xf32>
    %c5 = arith.constant 5 : index
    %c0_19 = arith.constant 0 : index
    %c0_20 = arith.constant 0 : index
    %33 = vector.load %arg3[%c5, %c0_19, %c0_20] : memref<49x1x256xf32, #tpu.memory_space<vmem>>, vector<1x1x256xf32>
    %34 = vector.shape_cast %33 : vector<1x1x256xf32> to vector<1x256xf32>
    %35 = vector.broadcast %34 : vector<1x256xf32> to vector<8x256xf32>
    %36 = arith.mulf %32, %35 : vector<8x256xf32>
    %c40 = arith.constant 40 : index
    %c0_21 = arith.constant 0 : index
    %37 = vector.load %arg6[%c40, %c0_21] : memref<392x256xf32, #tpu.memory_space<vmem>>, vector<8x256xf32>
    tpu.vector_store %arg6[%c40, %c0_21], %36 {strides = array<i32>} : memref<392x256xf32, #tpu.memory_space<vmem>>, vector<8x256xf32>,
    %c45_i32 = arith.constant 45 : i32
    %38 = tpu.dynamic_rotate %1 by %c45_i32 dim 1 : vector<8x256xf32>, i32 -> vector<8x256xf32>
    %c6 = arith.constant 6 : index
    %c0_22 = arith.constant 0 : index
    %c0_23 = arith.constant 0 : index
    %39 = vector.load %arg3[%c6, %c0_22, %c0_23] : memref<49x1x256xf32, #tpu.memory_space<vmem>>, vector<1x1x256xf32>
    %40 = vector.shape_cast %39 : vector<1x1x256xf32> to vector<1x256xf32>
    %41 = vector.broadcast %40 : vector<1x256xf32> to vector<8x256xf32>
    %42 = arith.mulf %38, %41 : vector<8x256xf32>
    %c48 = arith.constant 48 : index
    %c0_24 = arith.constant 0 : index
    %43 = vector.load %arg6[%c48, %c0_24] : memref<392x256xf32, #tpu.memory_space<vmem>>, vector<8x256xf32>
    tpu.vector_store %arg6[%c48, %c0_24], %42 {strides = array<i32>} : memref<392x256xf32, #tpu.memory_space<vmem>>, vector<8x256xf32>,
    %c35_i32 = arith.constant 35 : i32
    %44 = tpu.dynamic_rotate %1 by %c35_i32 dim 1 : vector<8x256xf32>, i32 -> vector<8x256xf32>
    %c7 = arith.constant 7 : index
    %c0_25 = arith.constant 0 : index
    %c0_26 = arith.constant 0 : index
    %45 = vector.load %arg3[%c7, %c0_25, %c0_26] : memref<49x1x256xf32, #tpu.memory_space<vmem>>, vector<1x1x256xf32>
    %46 = vector.shape_cast %45 : vector<1x1x256xf32> to vector<1x256xf32>
    %47 = vector.broadcast %46 : vector<1x256xf32> to vector<8x256xf32>
    %48 = arith.mulf %44, %47 : vector<8x256xf32>
    %c56 = arith.constant 56 : index
    %c0_27 = arith.constant 0 : index
    %49 = vector.load %arg6[%c56, %c0_27] : memref<392x256xf32, #tpu.memory_space<vmem>>, vector<8x256xf32>
    tpu.vector_store %arg6[%c56, %c0_27], %48 {strides = array<i32>} : memref<392x256xf32, #tpu.memory_space<vmem>>, vector<8x256xf32>,
    %c34_i32 = arith.constant 34 : i32
    %50 = tpu.dynamic_rotate %1 by %c34_i32 dim 1 : vector<8x256xf32>, i32 -> vector<8x256xf32>
    %c8_28 = arith.constant 8 : index
    %c0_29 = arith.constant 0 : index
    %c0_30 = arith.constant 0 : index
    %51 = vector.load %arg3[%c8_28, %c0_29, %c0_30] : memref<49x1x256xf32, #tpu.memory_space<vmem>>, vector<1x1x256xf32>
    %52 = vector.shape_cast %51 : vector<1x1x256xf32> to vector<1x256xf32>
    %53 = vector.broadcast %52 : vector<1x256xf32> to vector<8x256xf32>
    %54 = arith.mulf %50, %53 : vector<8x256xf32>
    %c64 = arith.constant 64 : index
    %c0_31 = arith.constant 0 : index
    %55 = vector.load %arg6[%c64, %c0_31] : memref<392x256xf32, #tpu.memory_space<vmem>>, vector<8x256xf32>
    tpu.vector_store %arg6[%c64, %c0_31], %54 {strides = array<i32>} : memref<392x256xf32, #tpu.memory_space<vmem>>, vector<8x256xf32>,
    %c33_i32 = arith.constant 33 : i32
    %56 = tpu.dynamic_rotate %1 by %c33_i32 dim 1 : vector<8x256xf32>, i32 -> vector<8x256xf32>
    %c9 = arith.constant 9 : index
    %c0_32 = arith.constant 0 : index
    %c0_33 = arith.constant 0 : index
    %57 = vector.load %arg3[%c9, %c0_32, %c0_33] : memref<49x1x256xf32, #tpu.memory_space<vmem>>, vector<1x1x256xf32>
    %58 = vector.shape_cast %57 : vector<1x1x256xf32> to vector<1x256xf32>
    %59 = vector.broadcast %58 : vector<1x256xf32> to vector<8x256xf32>
    %60 = arith.mulf %56, %59 : vector<8x256xf32>
    %c72 = arith.constant 72 : index
    %c0_34 = arith.constant 0 : index
    %61 = vector.load %arg6[%c72, %c0_34] : memref<392x256xf32, #tpu.memory_space<vmem>>, vector<8x256xf32>
    tpu.vector_store %arg6[%c72, %c0_34], %60 {strides = array<i32>} : memref<392x256xf32, #tpu.memory_space<vmem>>, vector<8x256xf32>,
    %c32_i32 = arith.constant 32 : i32
    %62 = tpu.dynamic_rotate %1 by %c32_i32 dim 1 : vector<8x256xf32>, i32 -> vector<8x256xf32>
    %c10 = arith.constant 10 : index
    %c0_35 = arith.constant 0 : index
    %c0_36 = arith.constant 0 : index
    %63 = vector.load %arg3[%c10, %c0_35, %c0_36] : memref<49x1x256xf32, #tpu.memory_space<vmem>>, vector<1x1x256xf32>
    %64 = vector.shape_cast %63 : vector<1x1x256xf32> to vector<1x256xf32>
    %65 = vector.broadcast %64 : vector<1x256xf32> to vector<8x256xf32>
    %66 = arith.mulf %62, %65 : vector<8x256xf32>
    %c80 = arith.constant 80 : index
    %c0_37 = arith.constant 0 : index
    %67 = vector.load %arg6[%c80, %c0_37] : memref<392x256xf32, #tpu.memory_space<vmem>>, vector<8x256xf32>
    tpu.vector_store %arg6[%c80, %c0_37], %66 {strides = array<i32>} : memref<392x256xf32, #tpu.memory_space<vmem>>, vector<8x256xf32>,
    %c31_i32 = arith.constant 31 : i32
    %68 = tpu.dynamic_rotate %1 by %c31_i32 dim 1 : vector<8x256xf32>, i32 -> vector<8x256xf32>
    %c11 = arith.constant 11 : index
    %c0_38 = arith.constant 0 : index
    %c0_39 = arith.constant 0 : index
    %69 = vector.load %arg3[%c11, %c0_38, %c0_39] : memref<49x1x256xf32, #tpu.memory_space<vmem>>, vector<1x1x256xf32>
    %70 = vector.shape_cast %69 : vector<1x1x256xf32> to vector<1x256xf32>
    %71 = vector.broadcast %70 : vector<1x256xf32> to vector<8x256xf32>
    %72 = arith.mulf %68, %71 : vector<8x256xf32>
    %c88 = arith.constant 88 : index
    %c0_40 = arith.constant 0 : index
    %73 = vector.load %arg6[%c88, %c0_40] : memref<392x256xf32, #tpu.memory_space<vmem>>, vector<8x256xf32>
    tpu.vector_store %arg6[%c88, %c0_40], %72 {strides = array<i32>} : memref<392x256xf32, #tpu.memory_space<vmem>>, vector<8x256xf32>,
    %c30_i32 = arith.constant 30 : i32
    %74 = tpu.dynamic_rotate %1 by %c30_i32 dim 1 : vector<8x256xf32>, i32 -> vector<8x256xf32>
    %c12 = arith.constant 12 : index
    %c0_41 = arith.constant 0 : index
    %c0_42 = arith.constant 0 : index
    %75 = vector.load %arg3[%c12, %c0_41, %c0_42] : memref<49x1x256xf32, #tpu.memory_space<vmem>>, vector<1x1x256xf32>
    %76 = vector.shape_cast %75 : vector<1x1x256xf32> to vector<1x256xf32>
    %77 = vector.broadcast %76 : vector<1x256xf32> to vector<8x256xf32>
    %78 = arith.mulf %74, %77 : vector<8x256xf32>
    %c96 = arith.constant 96 : index
    %c0_43 = arith.constant 0 : index
    %79 = vector.load %arg6[%c96, %c0_43] : memref<392x256xf32, #tpu.memory_space<vmem>>, vector<8x256xf32>
    tpu.vector_store %arg6[%c96, %c0_43], %78 {strides = array<i32>} : memref<392x256xf32, #tpu.memory_space<vmem>>, vector<8x256xf32>,
    %c29_i32 = arith.constant 29 : i32
    %80 = tpu.dynamic_rotate %1 by %c29_i32 dim 1 : vector<8x256xf32>, i32 -> vector<8x256xf32>
    %c13 = arith.constant 13 : index
    %c0_44 = arith.constant 0 : index
    %c0_45 = arith.constant 0 : index
    %81 = vector.load %arg3[%c13, %c0_44, %c0_45] : memref<49x1x256xf32, #tpu.memory_space<vmem>>, vector<1x1x256xf32>
    %82 = vector.shape_cast %81 : vector<1x1x256xf32> to vector<1x256xf32>
    %83 = vector.broadcast %82 : vector<1x256xf32> to vector<8x256xf32>
    %84 = arith.mulf %80, %83 : vector<8x256xf32>
    %c104 = arith.constant 104 : index
    %c0_46 = arith.constant 0 : index
    %85 = vector.load %arg6[%c104, %c0_46] : memref<392x256xf32, #tpu.memory_space<vmem>>, vector<8x256xf32>
    tpu.vector_store %arg6[%c104, %c0_46], %84 {strides = array<i32>} : memref<392x256xf32, #tpu.memory_space<vmem>>, vector<8x256xf32>,
    %c19_i32 = arith.constant 19 : i32
    %86 = tpu.dynamic_rotate %1 by %c19_i32 dim 1 : vector<8x256xf32>, i32 -> vector<8x256xf32>
    %c14 = arith.constant 14 : index
    %c0_47 = arith.constant 0 : index
    %c0_48 = arith.constant 0 : index
    %87 = vector.load %arg3[%c14, %c0_47, %c0_48] : memref<49x1x256xf32, #tpu.memory_space<vmem>>, vector<1x1x256xf32>
    %88 = vector.shape_cast %87 : vector<1x1x256xf32> to vector<1x256xf32>
    %89 = vector.broadcast %88 : vector<1x256xf32> to vector<8x256xf32>
    %90 = arith.mulf %86, %89 : vector<8x256xf32>
    %c112 = arith.constant 112 : index
    %c0_49 = arith.constant 0 : index
    %91 = vector.load %arg6[%c112, %c0_49] : memref<392x256xf32, #tpu.memory_space<vmem>>, vector<8x256xf32>
    tpu.vector_store %arg6[%c112, %c0_49], %90 {strides = array<i32>} : memref<392x256xf32, #tpu.memory_space<vmem>>, vector<8x256xf32>,
    %c18_i32 = arith.constant 18 : i32
    %92 = tpu.dynamic_rotate %1 by %c18_i32 dim 1 : vector<8x256xf32>, i32 -> vector<8x256xf32>
    %c15 = arith.constant 15 : index
    %c0_50 = arith.constant 0 : index
    %c0_51 = arith.constant 0 : index
    %93 = vector.load %arg3[%c15, %c0_50, %c0_51] : memref<49x1x256xf32, #tpu.memory_space<vmem>>, vector<1x1x256xf32>
    %94 = vector.shape_cast %93 : vector<1x1x256xf32> to vector<1x256xf32>
    %95 = vector.broadcast %94 : vector<1x256xf32> to vector<8x256xf32>
    %96 = arith.mulf %92, %95 : vector<8x256xf32>
    %c120 = arith.constant 120 : index
    %c0_52 = arith.constant 0 : index
    %97 = vector.load %arg6[%c120, %c0_52] : memref<392x256xf32, #tpu.memory_space<vmem>>, vector<8x256xf32>
    tpu.vector_store %arg6[%c120, %c0_52], %96 {strides = array<i32>} : memref<392x256xf32, #tpu.memory_space<vmem>>, vector<8x256xf32>,
    %c17_i32 = arith.constant 17 : i32
    %98 = tpu.dynamic_rotate %1 by %c17_i32 dim 1 : vector<8x256xf32>, i32 -> vector<8x256xf32>
    %c16_53 = arith.constant 16 : index
    %c0_54 = arith.constant 0 : index
    %c0_55 = arith.constant 0 : index
    %99 = vector.load %arg3[%c16_53, %c0_54, %c0_55] : memref<49x1x256xf32, #tpu.memory_space<vmem>>, vector<1x1x256xf32>
    %100 = vector.shape_cast %99 : vector<1x1x256xf32> to vector<1x256xf32>
    %101 = vector.broadcast %100 : vector<1x256xf32> to vector<8x256xf32>
    %102 = arith.mulf %98, %101 : vector<8x256xf32>
    %c128 = arith.constant 128 : index
    %c0_56 = arith.constant 0 : index
    %103 = vector.load %arg6[%c128, %c0_56] : memref<392x256xf32, #tpu.memory_space<vmem>>, vector<8x256xf32>
    tpu.vector_store %arg6[%c128, %c0_56], %102 {strides = array<i32>} : memref<392x256xf32, #tpu.memory_space<vmem>>, vector<8x256xf32>,
    %c16_i32 = arith.constant 16 : i32
    %104 = tpu.dynamic_rotate %1 by %c16_i32 dim 1 : vector<8x256xf32>, i32 -> vector<8x256xf32>
    %c17 = arith.constant 17 : index
    %c0_57 = arith.constant 0 : index
    %c0_58 = arith.constant 0 : index
    %105 = vector.load %arg3[%c17, %c0_57, %c0_58] : memref<49x1x256xf32, #tpu.memory_space<vmem>>, vector<1x1x256xf32>
    %106 = vector.shape_cast %105 : vector<1x1x256xf32> to vector<1x256xf32>
    %107 = vector.broadcast %106 : vector<1x256xf32> to vector<8x256xf32>
    %108 = arith.mulf %104, %107 : vector<8x256xf32>
    %c136 = arith.constant 136 : index
    %c0_59 = arith.constant 0 : index
    %109 = vector.load %arg6[%c136, %c0_59] : memref<392x256xf32, #tpu.memory_space<vmem>>, vector<8x256xf32>
    tpu.vector_store %arg6[%c136, %c0_59], %108 {strides = array<i32>} : memref<392x256xf32, #tpu.memory_space<vmem>>, vector<8x256xf32>,
    %c15_i32 = arith.constant 15 : i32
    %110 = tpu.dynamic_rotate %1 by %c15_i32 dim 1 : vector<8x256xf32>, i32 -> vector<8x256xf32>
    %c18 = arith.constant 18 : index
    %c0_60 = arith.constant 0 : index
    %c0_61 = arith.constant 0 : index
    %111 = vector.load %arg3[%c18, %c0_60, %c0_61] : memref<49x1x256xf32, #tpu.memory_space<vmem>>, vector<1x1x256xf32>
    %112 = vector.shape_cast %111 : vector<1x1x256xf32> to vector<1x256xf32>
    %113 = vector.broadcast %112 : vector<1x256xf32> to vector<8x256xf32>
    %114 = arith.mulf %110, %113 : vector<8x256xf32>
    %c144 = arith.constant 144 : index
    %c0_62 = arith.constant 0 : index
    %115 = vector.load %arg6[%c144, %c0_62] : memref<392x256xf32, #tpu.memory_space<vmem>>, vector<8x256xf32>
    tpu.vector_store %arg6[%c144, %c0_62], %114 {strides = array<i32>} : memref<392x256xf32, #tpu.memory_space<vmem>>, vector<8x256xf32>,
    %c14_i32 = arith.constant 14 : i32
    %116 = tpu.dynamic_rotate %1 by %c14_i32 dim 1 : vector<8x256xf32>, i32 -> vector<8x256xf32>
    %c19 = arith.constant 19 : index
    %c0_63 = arith.constant 0 : index
    %c0_64 = arith.constant 0 : index
    %117 = vector.load %arg3[%c19, %c0_63, %c0_64] : memref<49x1x256xf32, #tpu.memory_space<vmem>>, vector<1x1x256xf32>
    %118 = vector.shape_cast %117 : vector<1x1x256xf32> to vector<1x256xf32>
    %119 = vector.broadcast %118 : vector<1x256xf32> to vector<8x256xf32>
    %120 = arith.mulf %116, %119 : vector<8x256xf32>
    %c152 = arith.constant 152 : index
    %c0_65 = arith.constant 0 : index
    %121 = vector.load %arg6[%c152, %c0_65] : memref<392x256xf32, #tpu.memory_space<vmem>>, vector<8x256xf32>
    tpu.vector_store %arg6[%c152, %c0_65], %120 {strides = array<i32>} : memref<392x256xf32, #tpu.memory_space<vmem>>, vector<8x256xf32>,
    %c13_i32 = arith.constant 13 : i32
    %122 = tpu.dynamic_rotate %1 by %c13_i32 dim 1 : vector<8x256xf32>, i32 -> vector<8x256xf32>
    %c20 = arith.constant 20 : index
    %c0_66 = arith.constant 0 : index
    %c0_67 = arith.constant 0 : index
    %123 = vector.load %arg3[%c20, %c0_66, %c0_67] : memref<49x1x256xf32, #tpu.memory_space<vmem>>, vector<1x1x256xf32>
    %124 = vector.shape_cast %123 : vector<1x1x256xf32> to vector<1x256xf32>
    %125 = vector.broadcast %124 : vector<1x256xf32> to vector<8x256xf32>
    %126 = arith.mulf %122, %125 : vector<8x256xf32>
    %c160 = arith.constant 160 : index
    %c0_68 = arith.constant 0 : index
    %127 = vector.load %arg6[%c160, %c0_68] : memref<392x256xf32, #tpu.memory_space<vmem>>, vector<8x256xf32>
    tpu.vector_store %arg6[%c160, %c0_68], %126 {strides = array<i32>} : memref<392x256xf32, #tpu.memory_space<vmem>>, vector<8x256xf32>,
    %c3_i32 = arith.constant 3 : i32
    %128 = tpu.dynamic_rotate %1 by %c3_i32 dim 1 : vector<8x256xf32>, i32 -> vector<8x256xf32>
    %c21 = arith.constant 21 : index
    %c0_69 = arith.constant 0 : index
    %c0_70 = arith.constant 0 : index
    %129 = vector.load %arg3[%c21, %c0_69, %c0_70] : memref<49x1x256xf32, #tpu.memory_space<vmem>>, vector<1x1x256xf32>
    %130 = vector.shape_cast %129 : vector<1x1x256xf32> to vector<1x256xf32>
    %131 = vector.broadcast %130 : vector<1x256xf32> to vector<8x256xf32>
    %132 = arith.mulf %128, %131 : vector<8x256xf32>
    %c168 = arith.constant 168 : index
    %c0_71 = arith.constant 0 : index
    %133 = vector.load %arg6[%c168, %c0_71] : memref<392x256xf32, #tpu.memory_space<vmem>>, vector<8x256xf32>
    tpu.vector_store %arg6[%c168, %c0_71], %132 {strides = array<i32>} : memref<392x256xf32, #tpu.memory_space<vmem>>, vector<8x256xf32>,
    %c2_i32 = arith.constant 2 : i32
    %134 = tpu.dynamic_rotate %1 by %c2_i32 dim 1 : vector<8x256xf32>, i32 -> vector<8x256xf32>
    %c22 = arith.constant 22 : index
    %c0_72 = arith.constant 0 : index
    %c0_73 = arith.constant 0 : index
    %135 = vector.load %arg3[%c22, %c0_72, %c0_73] : memref<49x1x256xf32, #tpu.memory_space<vmem>>, vector<1x1x256xf32>
    %136 = vector.shape_cast %135 : vector<1x1x256xf32> to vector<1x256xf32>
    %137 = vector.broadcast %136 : vector<1x256xf32> to vector<8x256xf32>
    %138 = arith.mulf %134, %137 : vector<8x256xf32>
    %c176 = arith.constant 176 : index
    %c0_74 = arith.constant 0 : index
    %139 = vector.load %arg6[%c176, %c0_74] : memref<392x256xf32, #tpu.memory_space<vmem>>, vector<8x256xf32>
    tpu.vector_store %arg6[%c176, %c0_74], %138 {strides = array<i32>} : memref<392x256xf32, #tpu.memory_space<vmem>>, vector<8x256xf32>,
    %c1_i32 = arith.constant 1 : i32
    %140 = tpu.dynamic_rotate %1 by %c1_i32 dim 1 : vector<8x256xf32>, i32 -> vector<8x256xf32>
    %c23 = arith.constant 23 : index
    %c0_75 = arith.constant 0 : index
    %c0_76 = arith.constant 0 : index
    %141 = vector.load %arg3[%c23, %c0_75, %c0_76] : memref<49x1x256xf32, #tpu.memory_space<vmem>>, vector<1x1x256xf32>
    %142 = vector.shape_cast %141 : vector<1x1x256xf32> to vector<1x256xf32>
    %143 = vector.broadcast %142 : vector<1x256xf32> to vector<8x256xf32>
    %144 = arith.mulf %140, %143 : vector<8x256xf32>
    %c184 = arith.constant 184 : index
    %c0_77 = arith.constant 0 : index
    %145 = vector.load %arg6[%c184, %c0_77] : memref<392x256xf32, #tpu.memory_space<vmem>>, vector<8x256xf32>
    tpu.vector_store %arg6[%c184, %c0_77], %144 {strides = array<i32>} : memref<392x256xf32, #tpu.memory_space<vmem>>, vector<8x256xf32>,
    %c192 = arith.constant 192 : index
    %c0_78 = arith.constant 0 : index
    %146 = vector.load %arg6[%c192, %c0_78] : memref<392x256xf32, #tpu.memory_space<vmem>>, vector<8x256xf32>
    tpu.vector_store %arg6[%c192, %c0_78], %1 {strides = array<i32>} : memref<392x256xf32, #tpu.memory_space<vmem>>, vector<8x256xf32>,
    %c255_i32 = arith.constant 255 : i32
    %147 = tpu.dynamic_rotate %1 by %c255_i32 dim 1 : vector<8x256xf32>, i32 -> vector<8x256xf32>
    %c25 = arith.constant 25 : index
    %c0_79 = arith.constant 0 : index
    %c0_80 = arith.constant 0 : index
    %148 = vector.load %arg3[%c25, %c0_79, %c0_80] : memref<49x1x256xf32, #tpu.memory_space<vmem>>, vector<1x1x256xf32>
    %149 = vector.shape_cast %148 : vector<1x1x256xf32> to vector<1x256xf32>
    %150 = vector.broadcast %149 : vector<1x256xf32> to vector<8x256xf32>
    %151 = arith.mulf %147, %150 : vector<8x256xf32>
    %c200 = arith.constant 200 : index
    %c0_81 = arith.constant 0 : index
    %152 = vector.load %arg6[%c200, %c0_81] : memref<392x256xf32, #tpu.memory_space<vmem>>, vector<8x256xf32>
    tpu.vector_store %arg6[%c200, %c0_81], %151 {strides = array<i32>} : memref<392x256xf32, #tpu.memory_space<vmem>>, vector<8x256xf32>,
    %c254_i32 = arith.constant 254 : i32
    %153 = tpu.dynamic_rotate %1 by %c254_i32 dim 1 : vector<8x256xf32>, i32 -> vector<8x256xf32>
    %c26 = arith.constant 26 : index
    %c0_82 = arith.constant 0 : index
    %c0_83 = arith.constant 0 : index
    %154 = vector.load %arg3[%c26, %c0_82, %c0_83] : memref<49x1x256xf32, #tpu.memory_space<vmem>>, vector<1x1x256xf32>
    %155 = vector.shape_cast %154 : vector<1x1x256xf32> to vector<1x256xf32>
    %156 = vector.broadcast %155 : vector<1x256xf32> to vector<8x256xf32>
    %157 = arith.mulf %153, %156 : vector<8x256xf32>
    %c208 = arith.constant 208 : index
    %c0_84 = arith.constant 0 : index
    %158 = vector.load %arg6[%c208, %c0_84] : memref<392x256xf32, #tpu.memory_space<vmem>>, vector<8x256xf32>
    tpu.vector_store %arg6[%c208, %c0_84], %157 {strides = array<i32>} : memref<392x256xf32, #tpu.memory_space<vmem>>, vector<8x256xf32>,
    %c253_i32 = arith.constant 253 : i32
    %159 = tpu.dynamic_rotate %1 by %c253_i32 dim 1 : vector<8x256xf32>, i32 -> vector<8x256xf32>
    %c27 = arith.constant 27 : index
    %c0_85 = arith.constant 0 : index
    %c0_86 = arith.constant 0 : index
    %160 = vector.load %arg3[%c27, %c0_85, %c0_86] : memref<49x1x256xf32, #tpu.memory_space<vmem>>, vector<1x1x256xf32>
    %161 = vector.shape_cast %160 : vector<1x1x256xf32> to vector<1x256xf32>
    %162 = vector.broadcast %161 : vector<1x256xf32> to vector<8x256xf32>
    %163 = arith.mulf %159, %162 : vector<8x256xf32>
    %c216 = arith.constant 216 : index
    %c0_87 = arith.constant 0 : index
    %164 = vector.load %arg6[%c216, %c0_87] : memref<392x256xf32, #tpu.memory_space<vmem>>, vector<8x256xf32>
    tpu.vector_store %arg6[%c216, %c0_87], %163 {strides = array<i32>} : memref<392x256xf32, #tpu.memory_space<vmem>>, vector<8x256xf32>,
    %c243_i32 = arith.constant 243 : i32
    %165 = tpu.dynamic_rotate %1 by %c243_i32 dim 1 : vector<8x256xf32>, i32 -> vector<8x256xf32>
    %c28 = arith.constant 28 : index
    %c0_88 = arith.constant 0 : index
    %c0_89 = arith.constant 0 : index
    %166 = vector.load %arg3[%c28, %c0_88, %c0_89] : memref<49x1x256xf32, #tpu.memory_space<vmem>>, vector<1x1x256xf32>
    %167 = vector.shape_cast %166 : vector<1x1x256xf32> to vector<1x256xf32>
    %168 = vector.broadcast %167 : vector<1x256xf32> to vector<8x256xf32>
    %169 = arith.mulf %165, %168 : vector<8x256xf32>
    %c224 = arith.constant 224 : index
    %c0_90 = arith.constant 0 : index
    %170 = vector.load %arg6[%c224, %c0_90] : memref<392x256xf32, #tpu.memory_space<vmem>>, vector<8x256xf32>
    tpu.vector_store %arg6[%c224, %c0_90], %169 {strides = array<i32>} : memref<392x256xf32, #tpu.memory_space<vmem>>, vector<8x256xf32>,
    %c242_i32 = arith.constant 242 : i32
    %171 = tpu.dynamic_rotate %1 by %c242_i32 dim 1 : vector<8x256xf32>, i32 -> vector<8x256xf32>
    %c29 = arith.constant 29 : index
    %c0_91 = arith.constant 0 : index
    %c0_92 = arith.constant 0 : index
    %172 = vector.load %arg3[%c29, %c0_91, %c0_92] : memref<49x1x256xf32, #tpu.memory_space<vmem>>, vector<1x1x256xf32>
    %173 = vector.shape_cast %172 : vector<1x1x256xf32> to vector<1x256xf32>
    %174 = vector.broadcast %173 : vector<1x256xf32> to vector<8x256xf32>
    %175 = arith.mulf %171, %174 : vector<8x256xf32>
    %c232 = arith.constant 232 : index
    %c0_93 = arith.constant 0 : index
    %176 = vector.load %arg6[%c232, %c0_93] : memref<392x256xf32, #tpu.memory_space<vmem>>, vector<8x256xf32>
    tpu.vector_store %arg6[%c232, %c0_93], %175 {strides = array<i32>} : memref<392x256xf32, #tpu.memory_space<vmem>>, vector<8x256xf32>,
    %c241_i32 = arith.constant 241 : i32
    %177 = tpu.dynamic_rotate %1 by %c241_i32 dim 1 : vector<8x256xf32>, i32 -> vector<8x256xf32>
    %c30 = arith.constant 30 : index
    %c0_94 = arith.constant 0 : index
    %c0_95 = arith.constant 0 : index
    %178 = vector.load %arg3[%c30, %c0_94, %c0_95] : memref<49x1x256xf32, #tpu.memory_space<vmem>>, vector<1x1x256xf32>
    %179 = vector.shape_cast %178 : vector<1x1x256xf32> to vector<1x256xf32>
    %180 = vector.broadcast %179 : vector<1x256xf32> to vector<8x256xf32>
    %181 = arith.mulf %177, %180 : vector<8x256xf32>
    %c240 = arith.constant 240 : index
    %c0_96 = arith.constant 0 : index
    %182 = vector.load %arg6[%c240, %c0_96] : memref<392x256xf32, #tpu.memory_space<vmem>>, vector<8x256xf32>
    tpu.vector_store %arg6[%c240, %c0_96], %181 {strides = array<i32>} : memref<392x256xf32, #tpu.memory_space<vmem>>, vector<8x256xf32>,
    %c240_i32 = arith.constant 240 : i32
    %183 = tpu.dynamic_rotate %1 by %c240_i32 dim 1 : vector<8x256xf32>, i32 -> vector<8x256xf32>
    %c31 = arith.constant 31 : index
    %c0_97 = arith.constant 0 : index
    %c0_98 = arith.constant 0 : index
    %184 = vector.load %arg3[%c31, %c0_97, %c0_98] : memref<49x1x256xf32, #tpu.memory_space<vmem>>, vector<1x1x256xf32>
    %185 = vector.shape_cast %184 : vector<1x1x256xf32> to vector<1x256xf32>
    %186 = vector.broadcast %185 : vector<1x256xf32> to vector<8x256xf32>
    %187 = arith.mulf %183, %186 : vector<8x256xf32>
    %c248 = arith.constant 248 : index
    %c0_99 = arith.constant 0 : index
    %188 = vector.load %arg6[%c248, %c0_99] : memref<392x256xf32, #tpu.memory_space<vmem>>, vector<8x256xf32>
    tpu.vector_store %arg6[%c248, %c0_99], %187 {strides = array<i32>} : memref<392x256xf32, #tpu.memory_space<vmem>>, vector<8x256xf32>,
    %c239_i32 = arith.constant 239 : i32
    %189 = tpu.dynamic_rotate %1 by %c239_i32 dim 1 : vector<8x256xf32>, i32 -> vector<8x256xf32>
    %c32_100 = arith.constant 32 : index
    %c0_101 = arith.constant 0 : index
    %c0_102 = arith.constant 0 : index
    %190 = vector.load %arg3[%c32_100, %c0_101, %c0_102] : memref<49x1x256xf32, #tpu.memory_space<vmem>>, vector<1x1x256xf32>
    %191 = vector.shape_cast %190 : vector<1x1x256xf32> to vector<1x256xf32>
    %192 = vector.broadcast %191 : vector<1x256xf32> to vector<8x256xf32>
    %193 = arith.mulf %189, %192 : vector<8x256xf32>
    %c256 = arith.constant 256 : index
    %c0_103 = arith.constant 0 : index
    %194 = vector.load %arg6[%c256, %c0_103] : memref<392x256xf32, #tpu.memory_space<vmem>>, vector<8x256xf32>
    tpu.vector_store %arg6[%c256, %c0_103], %193 {strides = array<i32>} : memref<392x256xf32, #tpu.memory_space<vmem>>, vector<8x256xf32>,
    %c238_i32 = arith.constant 238 : i32
    %195 = tpu.dynamic_rotate %1 by %c238_i32 dim 1 : vector<8x256xf32>, i32 -> vector<8x256xf32>
    %c33 = arith.constant 33 : index
    %c0_104 = arith.constant 0 : index
    %c0_105 = arith.constant 0 : index
    %196 = vector.load %arg3[%c33, %c0_104, %c0_105] : memref<49x1x256xf32, #tpu.memory_space<vmem>>, vector<1x1x256xf32>
    %197 = vector.shape_cast %196 : vector<1x1x256xf32> to vector<1x256xf32>
    %198 = vector.broadcast %197 : vector<1x256xf32> to vector<8x256xf32>
    %199 = arith.mulf %195, %198 : vector<8x256xf32>
    %c264 = arith.constant 264 : index
    %c0_106 = arith.constant 0 : index
    %200 = vector.load %arg6[%c264, %c0_106] : memref<392x256xf32, #tpu.memory_space<vmem>>, vector<8x256xf32>
    tpu.vector_store %arg6[%c264, %c0_106], %199 {strides = array<i32>} : memref<392x256xf32, #tpu.memory_space<vmem>>, vector<8x256xf32>,
    %c237_i32 = arith.constant 237 : i32
    %201 = tpu.dynamic_rotate %1 by %c237_i32 dim 1 : vector<8x256xf32>, i32 -> vector<8x256xf32>
    %c34 = arith.constant 34 : index
    %c0_107 = arith.constant 0 : index
    %c0_108 = arith.constant 0 : index
    %202 = vector.load %arg3[%c34, %c0_107, %c0_108] : memref<49x1x256xf32, #tpu.memory_space<vmem>>, vector<1x1x256xf32>
    %203 = vector.shape_cast %202 : vector<1x1x256xf32> to vector<1x256xf32>
    %204 = vector.broadcast %203 : vector<1x256xf32> to vector<8x256xf32>
    %205 = arith.mulf %201, %204 : vector<8x256xf32>
    %c272 = arith.constant 272 : index
    %c0_109 = arith.constant 0 : index
    %206 = vector.load %arg6[%c272, %c0_109] : memref<392x256xf32, #tpu.memory_space<vmem>>, vector<8x256xf32>
    tpu.vector_store %arg6[%c272, %c0_109], %205 {strides = array<i32>} : memref<392x256xf32, #tpu.memory_space<vmem>>, vector<8x256xf32>,
    %c227_i32 = arith.constant 227 : i32
    %207 = tpu.dynamic_rotate %1 by %c227_i32 dim 1 : vector<8x256xf32>, i32 -> vector<8x256xf32>
    %c35 = arith.constant 35 : index
    %c0_110 = arith.constant 0 : index
    %c0_111 = arith.constant 0 : index
    %208 = vector.load %arg3[%c35, %c0_110, %c0_111] : memref<49x1x256xf32, #tpu.memory_space<vmem>>, vector<1x1x256xf32>
    %209 = vector.shape_cast %208 : vector<1x1x256xf32> to vector<1x256xf32>
    %210 = vector.broadcast %209 : vector<1x256xf32> to vector<8x256xf32>
    %211 = arith.mulf %207, %210 : vector<8x256xf32>
    %c280 = arith.constant 280 : index
    %c0_112 = arith.constant 0 : index
    %212 = vector.load %arg6[%c280, %c0_112] : memref<392x256xf32, #tpu.memory_space<vmem>>, vector<8x256xf32>
    tpu.vector_store %arg6[%c280, %c0_112], %211 {strides = array<i32>} : memref<392x256xf32, #tpu.memory_space<vmem>>, vector<8x256xf32>,
    %c226_i32 = arith.constant 226 : i32
    %213 = tpu.dynamic_rotate %1 by %c226_i32 dim 1 : vector<8x256xf32>, i32 -> vector<8x256xf32>
    %c36 = arith.constant 36 : index
    %c0_113 = arith.constant 0 : index
    %c0_114 = arith.constant 0 : index
    %214 = vector.load %arg3[%c36, %c0_113, %c0_114] : memref<49x1x256xf32, #tpu.memory_space<vmem>>, vector<1x1x256xf32>
    %215 = vector.shape_cast %214 : vector<1x1x256xf32> to vector<1x256xf32>
    %216 = vector.broadcast %215 : vector<1x256xf32> to vector<8x256xf32>
    %217 = arith.mulf %213, %216 : vector<8x256xf32>
    %c288 = arith.constant 288 : index
    %c0_115 = arith.constant 0 : index
    %218 = vector.load %arg6[%c288, %c0_115] : memref<392x256xf32, #tpu.memory_space<vmem>>, vector<8x256xf32>
    tpu.vector_store %arg6[%c288, %c0_115], %217 {strides = array<i32>} : memref<392x256xf32, #tpu.memory_space<vmem>>, vector<8x256xf32>,
    %c225_i32 = arith.constant 225 : i32
    %219 = tpu.dynamic_rotate %1 by %c225_i32 dim 1 : vector<8x256xf32>, i32 -> vector<8x256xf32>
    %c37 = arith.constant 37 : index
    %c0_116 = arith.constant 0 : index
    %c0_117 = arith.constant 0 : index
    %220 = vector.load %arg3[%c37, %c0_116, %c0_117] : memref<49x1x256xf32, #tpu.memory_space<vmem>>, vector<1x1x256xf32>
    %221 = vector.shape_cast %220 : vector<1x1x256xf32> to vector<1x256xf32>
    %222 = vector.broadcast %221 : vector<1x256xf32> to vector<8x256xf32>
    %223 = arith.mulf %219, %222 : vector<8x256xf32>
    %c296 = arith.constant 296 : index
    %c0_118 = arith.constant 0 : index
    %224 = vector.load %arg6[%c296, %c0_118] : memref<392x256xf32, #tpu.memory_space<vmem>>, vector<8x256xf32>
    tpu.vector_store %arg6[%c296, %c0_118], %223 {strides = array<i32>} : memref<392x256xf32, #tpu.memory_space<vmem>>, vector<8x256xf32>,
    %c224_i32 = arith.constant 224 : i32
    %225 = tpu.dynamic_rotate %1 by %c224_i32 dim 1 : vector<8x256xf32>, i32 -> vector<8x256xf32>
    %c38 = arith.constant 38 : index
    %c0_119 = arith.constant 0 : index
    %c0_120 = arith.constant 0 : index
    %226 = vector.load %arg3[%c38, %c0_119, %c0_120] : memref<49x1x256xf32, #tpu.memory_space<vmem>>, vector<1x1x256xf32>
    %227 = vector.shape_cast %226 : vector<1x1x256xf32> to vector<1x256xf32>
    %228 = vector.broadcast %227 : vector<1x256xf32> to vector<8x256xf32>
    %229 = arith.mulf %225, %228 : vector<8x256xf32>
    %c304 = arith.constant 304 : index
    %c0_121 = arith.constant 0 : index
    %230 = vector.load %arg6[%c304, %c0_121] : memref<392x256xf32, #tpu.memory_space<vmem>>, vector<8x256xf32>
    tpu.vector_store %arg6[%c304, %c0_121], %229 {strides = array<i32>} : memref<392x256xf32, #tpu.memory_space<vmem>>, vector<8x256xf32>,
    %c223_i32 = arith.constant 223 : i32
    %231 = tpu.dynamic_rotate %1 by %c223_i32 dim 1 : vector<8x256xf32>, i32 -> vector<8x256xf32>
    %c39 = arith.constant 39 : index
    %c0_122 = arith.constant 0 : index
    %c0_123 = arith.constant 0 : index
    %232 = vector.load %arg3[%c39, %c0_122, %c0_123] : memref<49x1x256xf32, #tpu.memory_space<vmem>>, vector<1x1x256xf32>
    %233 = vector.shape_cast %232 : vector<1x1x256xf32> to vector<1x256xf32>
    %234 = vector.broadcast %233 : vector<1x256xf32> to vector<8x256xf32>
    %235 = arith.mulf %231, %234 : vector<8x256xf32>
    %c312 = arith.constant 312 : index
    %c0_124 = arith.constant 0 : index
    %236 = vector.load %arg6[%c312, %c0_124] : memref<392x256xf32, #tpu.memory_space<vmem>>, vector<8x256xf32>
    tpu.vector_store %arg6[%c312, %c0_124], %235 {strides = array<i32>} : memref<392x256xf32, #tpu.memory_space<vmem>>, vector<8x256xf32>,
    %c222_i32 = arith.constant 222 : i32
    %237 = tpu.dynamic_rotate %1 by %c222_i32 dim 1 : vector<8x256xf32>, i32 -> vector<8x256xf32>
    %c40_125 = arith.constant 40 : index
    %c0_126 = arith.constant 0 : index
    %c0_127 = arith.constant 0 : index
    %238 = vector.load %arg3[%c40_125, %c0_126, %c0_127] : memref<49x1x256xf32, #tpu.memory_space<vmem>>, vector<1x1x256xf32>
    %239 = vector.shape_cast %238 : vector<1x1x256xf32> to vector<1x256xf32>
    %240 = vector.broadcast %239 : vector<1x256xf32> to vector<8x256xf32>
    %241 = arith.mulf %237, %240 : vector<8x256xf32>
    %c320 = arith.constant 320 : index
    %c0_128 = arith.constant 0 : index
    %242 = vector.load %arg6[%c320, %c0_128] : memref<392x256xf32, #tpu.memory_space<vmem>>, vector<8x256xf32>
    tpu.vector_store %arg6[%c320, %c0_128], %241 {strides = array<i32>} : memref<392x256xf32, #tpu.memory_space<vmem>>, vector<8x256xf32>,
    %c221_i32 = arith.constant 221 : i32
    %243 = tpu.dynamic_rotate %1 by %c221_i32 dim 1 : vector<8x256xf32>, i32 -> vector<8x256xf32>
    %c41 = arith.constant 41 : index
    %c0_129 = arith.constant 0 : index
    %c0_130 = arith.constant 0 : index
    %244 = vector.load %arg3[%c41, %c0_129, %c0_130] : memref<49x1x256xf32, #tpu.memory_space<vmem>>, vector<1x1x256xf32>
    %245 = vector.shape_cast %244 : vector<1x1x256xf32> to vector<1x256xf32>
    %246 = vector.broadcast %245 : vector<1x256xf32> to vector<8x256xf32>
    %247 = arith.mulf %243, %246 : vector<8x256xf32>
    %c328 = arith.constant 328 : index
    %c0_131 = arith.constant 0 : index
    %248 = vector.load %arg6[%c328, %c0_131] : memref<392x256xf32, #tpu.memory_space<vmem>>, vector<8x256xf32>
    tpu.vector_store %arg6[%c328, %c0_131], %247 {strides = array<i32>} : memref<392x256xf32, #tpu.memory_space<vmem>>, vector<8x256xf32>,
    %c211_i32 = arith.constant 211 : i32
    %249 = tpu.dynamic_rotate %1 by %c211_i32 dim 1 : vector<8x256xf32>, i32 -> vector<8x256xf32>
    %c42 = arith.constant 42 : index
    %c0_132 = arith.constant 0 : index
    %c0_133 = arith.constant 0 : index
    %250 = vector.load %arg3[%c42, %c0_132, %c0_133] : memref<49x1x256xf32, #tpu.memory_space<vmem>>, vector<1x1x256xf32>
    %251 = vector.shape_cast %250 : vector<1x1x256xf32> to vector<1x256xf32>
    %252 = vector.broadcast %251 : vector<1x256xf32> to vector<8x256xf32>
    %253 = arith.mulf %249, %252 : vector<8x256xf32>
    %c336 = arith.constant 336 : index
    %c0_134 = arith.constant 0 : index
    %254 = vector.load %arg6[%c336, %c0_134] : memref<392x256xf32, #tpu.memory_space<vmem>>, vector<8x256xf32>
    tpu.vector_store %arg6[%c336, %c0_134], %253 {strides = array<i32>} : memref<392x256xf32, #tpu.memory_space<vmem>>, vector<8x256xf32>,
    %c210_i32 = arith.constant 210 : i32
    %255 = tpu.dynamic_rotate %1 by %c210_i32 dim 1 : vector<8x256xf32>, i32 -> vector<8x256xf32>
    %c43 = arith.constant 43 : index
    %c0_135 = arith.constant 0 : index
    %c0_136 = arith.constant 0 : index
    %256 = vector.load %arg3[%c43, %c0_135, %c0_136] : memref<49x1x256xf32, #tpu.memory_space<vmem>>, vector<1x1x256xf32>
    %257 = vector.shape_cast %256 : vector<1x1x256xf32> to vector<1x256xf32>
    %258 = vector.broadcast %257 : vector<1x256xf32> to vector<8x256xf32>
    %259 = arith.mulf %255, %258 : vector<8x256xf32>
    %c344 = arith.constant 344 : index
    %c0_137 = arith.constant 0 : index
    %260 = vector.load %arg6[%c344, %c0_137] : memref<392x256xf32, #tpu.memory_space<vmem>>, vector<8x256xf32>
    tpu.vector_store %arg6[%c344, %c0_137], %259 {strides = array<i32>} : memref<392x256xf32, #tpu.memory_space<vmem>>, vector<8x256xf32>,
    %c209_i32 = arith.constant 209 : i32
    %261 = tpu.dynamic_rotate %1 by %c209_i32 dim 1 : vector<8x256xf32>, i32 -> vector<8x256xf32>
    %c44 = arith.constant 44 : index
    %c0_138 = arith.constant 0 : index
    %c0_139 = arith.constant 0 : index
    %262 = vector.load %arg3[%c44, %c0_138, %c0_139] : memref<49x1x256xf32, #tpu.memory_space<vmem>>, vector<1x1x256xf32>
    %263 = vector.shape_cast %262 : vector<1x1x256xf32> to vector<1x256xf32>
    %264 = vector.broadcast %263 : vector<1x256xf32> to vector<8x256xf32>
    %265 = arith.mulf %261, %264 : vector<8x256xf32>
    %c352 = arith.constant 352 : index
    %c0_140 = arith.constant 0 : index
    %266 = vector.load %arg6[%c352, %c0_140] : memref<392x256xf32, #tpu.memory_space<vmem>>, vector<8x256xf32>
    tpu.vector_store %arg6[%c352, %c0_140], %265 {strides = array<i32>} : memref<392x256xf32, #tpu.memory_space<vmem>>, vector<8x256xf32>,
    %c208_i32 = arith.constant 208 : i32
    %267 = tpu.dynamic_rotate %1 by %c208_i32 dim 1 : vector<8x256xf32>, i32 -> vector<8x256xf32>
    %c45 = arith.constant 45 : index
    %c0_141 = arith.constant 0 : index
    %c0_142 = arith.constant 0 : index
    %268 = vector.load %arg3[%c45, %c0_141, %c0_142] : memref<49x1x256xf32, #tpu.memory_space<vmem>>, vector<1x1x256xf32>
    %269 = vector.shape_cast %268 : vector<1x1x256xf32> to vector<1x256xf32>
    %270 = vector.broadcast %269 : vector<1x256xf32> to vector<8x256xf32>
    %271 = arith.mulf %267, %270 : vector<8x256xf32>
    %c360 = arith.constant 360 : index
    %c0_143 = arith.constant 0 : index
    %272 = vector.load %arg6[%c360, %c0_143] : memref<392x256xf32, #tpu.memory_space<vmem>>, vector<8x256xf32>
    tpu.vector_store %arg6[%c360, %c0_143], %271 {strides = array<i32>} : memref<392x256xf32, #tpu.memory_space<vmem>>, vector<8x256xf32>,
    %c207_i32 = arith.constant 207 : i32
    %273 = tpu.dynamic_rotate %1 by %c207_i32 dim 1 : vector<8x256xf32>, i32 -> vector<8x256xf32>
    %c46 = arith.constant 46 : index
    %c0_144 = arith.constant 0 : index
    %c0_145 = arith.constant 0 : index
    %274 = vector.load %arg3[%c46, %c0_144, %c0_145] : memref<49x1x256xf32, #tpu.memory_space<vmem>>, vector<1x1x256xf32>
    %275 = vector.shape_cast %274 : vector<1x1x256xf32> to vector<1x256xf32>
    %276 = vector.broadcast %275 : vector<1x256xf32> to vector<8x256xf32>
    %277 = arith.mulf %273, %276 : vector<8x256xf32>
    %c368 = arith.constant 368 : index
    %c0_146 = arith.constant 0 : index
    %278 = vector.load %arg6[%c368, %c0_146] : memref<392x256xf32, #tpu.memory_space<vmem>>, vector<8x256xf32>
    tpu.vector_store %arg6[%c368, %c0_146], %277 {strides = array<i32>} : memref<392x256xf32, #tpu.memory_space<vmem>>, vector<8x256xf32>,
    %c206_i32 = arith.constant 206 : i32
    %279 = tpu.dynamic_rotate %1 by %c206_i32 dim 1 : vector<8x256xf32>, i32 -> vector<8x256xf32>
    %c47 = arith.constant 47 : index
    %c0_147 = arith.constant 0 : index
    %c0_148 = arith.constant 0 : index
    %280 = vector.load %arg3[%c47, %c0_147, %c0_148] : memref<49x1x256xf32, #tpu.memory_space<vmem>>, vector<1x1x256xf32>
    %281 = vector.shape_cast %280 : vector<1x1x256xf32> to vector<1x256xf32>
    %282 = vector.broadcast %281 : vector<1x256xf32> to vector<8x256xf32>
    %283 = arith.mulf %279, %282 : vector<8x256xf32>
    %c376 = arith.constant 376 : index
    %c0_149 = arith.constant 0 : index
    %284 = vector.load %arg6[%c376, %c0_149] : memref<392x256xf32, #tpu.memory_space<vmem>>, vector<8x256xf32>
    tpu.vector_store %arg6[%c376, %c0_149], %283 {strides = array<i32>} : memref<392x256xf32, #tpu.memory_space<vmem>>, vector<8x256xf32>,
    %c205_i32 = arith.constant 205 : i32
    %285 = tpu.dynamic_rotate %1 by %c205_i32 dim 1 : vector<8x256xf32>, i32 -> vector<8x256xf32>
    %c48_150 = arith.constant 48 : index
    %c0_151 = arith.constant 0 : index
    %c0_152 = arith.constant 0 : index
    %286 = vector.load %arg3[%c48_150, %c0_151, %c0_152] : memref<49x1x256xf32, #tpu.memory_space<vmem>>, vector<1x1x256xf32>
    %287 = vector.shape_cast %286 : vector<1x1x256xf32> to vector<1x256xf32>
    %288 = vector.broadcast %287 : vector<1x256xf32> to vector<8x256xf32>
    %289 = arith.mulf %285, %288 : vector<8x256xf32>
    %c384 = arith.constant 384 : index
    %c0_153 = arith.constant 0 : index
    %290 = vector.load %arg6[%c384, %c0_153] : memref<392x256xf32, #tpu.memory_space<vmem>>, vector<8x256xf32>
    tpu.vector_store %arg6[%c384, %c0_153], %289 {strides = array<i32>} : memref<392x256xf32, #tpu.memory_space<vmem>>, vector<8x256xf32>,
    %c0_154 = arith.constant 0 : index
    %c0_155 = arith.constant 0 : index
    %291 = vector.load %arg6[%c0_154, %c0_155] : memref<392x256xf32, #tpu.memory_space<vmem>>, vector<392x256xf32>
    %292 = arith.truncf %291 : vector<392x256xf32> to vector<392x256xbf16>
    %c0_156 = arith.constant 0 : index
    %c0_157 = arith.constant 0 : index
    %293 = vector.load %arg1[%c0_156, %c0_157] : memref<16x392xbf16, #tpu.memory_space<vmem>>, vector<16x392xbf16>
    %cst = arith.constant dense<0.000000e+00> : vector<16x256xf32>
    %294 = tpu.matmul %293, %292, %cst {dimension_numbers = #tpu.dot_dimension_numbers<[1], [0], [0], [1], [0, 0, 1, 1], [], []>} : vector<16x392xbf16>, vector<392x256xbf16>, vector<16x256xf32> -> vector<16x256xf32>
    %c0_158 = arith.constant 0 : index
    %c0_159 = arith.constant 0 : index
    %295 = vector.load %arg2[%c0_158, %c0_159] : memref<16x1xf32, #tpu.memory_space<vmem>>, vector<16x1xf32>
    %296 = vector.broadcast %295 : vector<16x1xf32> to vector<16x256xf32>
    %297 = arith.addf %294, %296 : vector<16x256xf32>
    %cst_160 = arith.constant 0.000000e+00 : f32
    %298 = vector.broadcast %cst_160 : f32 to vector<16x256xf32>
    %299 = arith.maximumf %297, %298 : vector<16x256xf32>
    %c0_161 = arith.constant 0 : index
    %c0_162 = arith.constant 0 : index
    %c0_163 = arith.constant 0 : index
    %300 = vector.load %arg5[%c0_161, %c0_162, %c0_163] : memref<1x16x256xf32, #tpu.memory_space<vmem>>, vector<1x16x256xf32>
    %301 = vector.shape_cast %300 : vector<1x16x256xf32> to vector<16x256xf32>
    %302 = vector.shape_cast %299 : vector<16x256xf32> to vector<1x16x256xf32>
    tpu.vector_store %arg5[%c0_161, %c0_162, %c0_163], %302 {strides = array<i32>} : memref<1x16x256xf32, #tpu.memory_space<vmem>>, vector<1x16x256xf32>,
    return
  }
  func.func @transform_0(%arg0: i32) -> (i32, i32) {
    %c0_i32 = arith.constant 0 : i32
    %c0_i32_0 = arith.constant 0 : i32
    %c0_i32_1 = arith.constant 0 : i32
    return %c0_i32, %c0_i32_0 : i32, i32
  }
  func.func @transform_1(%arg0: i32) -> (i32, i32) {
    %c0_i32 = arith.constant 0 : i32
    %c0_i32_0 = arith.constant 0 : i32
    %c0_i32_1 = arith.constant 0 : i32
    return %c0_i32, %c0_i32_0 : i32, i32
  }
  func.func @transform_2(%arg0: i32) -> (i32, i32, i32) {
    %c0_i32 = arith.constant 0 : i32
    %c0_i32_0 = arith.constant 0 : i32
    %c0_i32_1 = arith.constant 0 : i32
    %c0_i32_2 = arith.constant 0 : i32
    return %c0_i32, %c0_i32_0, %c0_i32_1 : i32, i32, i32
  }
  func.func @transform_3(%arg0: i32) -> (i32, i32, i32) {
    %c0_i32 = arith.constant 0 : i32
    %c0_i32_0 = arith.constant 0 : i32
    %c0_i32_1 = arith.constant 0 : i32
    return %arg0, %c0_i32, %c0_i32_0 : i32, i32, i32
  }
  func.func @transform_4(%arg0: i32) -> (i32, i32, i32) {
    %c0_i32 = arith.constant 0 : i32
    %c0_i32_0 = arith.constant 0 : i32
    %c0_i32_1 = arith.constant 0 : i32
    return %arg0, %c0_i32, %c0_i32_0 : i32, i32, i32
  }
}

</mosaic_0001>

<bundles_post_ra>
// kernel: tpu_custom_call.1
= control target key start
LH: loop header
LB: loop body
LE: loop exit
PB: predicated region body
PF: predicated region fallthrough
CT: control target
= control target key end

     0   :  { %9 = vsyncpa [#allocation4], 0  ;;  %s2717_s0 = inlined_call_operand.hbm [shape: bf16[16,392], index: 0, kind: input, shape index: {}]   ;;  %s2718_s1 = inlined_call_operand.vmem [shape: f32[16,1], index: 1, kind: input, shape index: {}]   ;;  %s2719_s2 = inlined_call_operand.hbm [shape: f32[49,1,256], index: 2, kind: input, shape index: {}]   ;;  %s2720_s3 = inlined_call_operand.hbm [shape: f32[2,8,256], index: 3, kind: input, shape index: {}]   ;;  %s2721_s4 = inlined_call_operand.hbm [shape: f32[2,16,256], index: 4, kind: output, shape index: {}]  }
   0x1   :  { %10 = vsyncpa [#allocation7], 0 }
   0x2   :  { %11 = vsyncpa [#allocation5], 0 }
   0x3   :  { %13 = vsyncpa [#allocation5 + $0x1], 0  ;;  %s2203_s15 = smov 0   ;;  %s2205_s16 = smov 0  }
   0x4   :  { %s2207_s17 = smov 0   ;;  %s2209_s18 = smov 0  }
   0x5 LB: > { %s2224_s19 = sadd.s32 4294967295, %s2118_s18   ;;  %s1793_s20 = sadd.s32 4294967294, %s2118_s18   ;;  %s2118_s18 = sphi %s2209_s18, %s2743_s18   ;;  %s2114_s17 = sphi %s2207_s17, %s2742_s17   ;;  %s2110_s16 = sphi %s2205_s16, %s2741_s16   ;;  %s2106_s15 = sphi %s2203_s15, %s2740_s15  }
   0x6   : > { %p102_p0 = scmp.ne.s32.totalorder %s2110_s16, %s2106_s15  ;;  %p2722_p1 = scmp.eq.s32.totalorder %s2224_s19, 0 }
   0x7   : > { %p132_p3 = scmp.eq.s32.totalorder %s1793_s20, 1  ;;  %p1794_p5 = scmp.ge.s32.totalorder %s2118_s18, 1 }
   0x8   : > { %p2233_p4 = por %p2722_p1, %p102_p0  ;;  %p139_p7 = scmp.lt.s32.totalorder %s2118_s18, 3 }
   0x9   : > { %p2238_p6 = por %p132_p3, %p102_p0  ;;  %s2120_s24 = smov [#allocation3]  }
   0xa   : > { %s2725_s21 = scalar_select %p2233_p4, 1, 0 }
   0xb   : > { %s2726_s22 = scalar_select %p2238_p6, 1, 0 }
   0xc   : > { %p2243_p8 = pnand %p1794_p5, %p139_p7  ;;  %s151_s25 = sshll.u32 %s2120_s24, 4  ;;  %s2247_s25 = int_to_ptr.vmem [resolvable:$true] %s151_s25 }
   0xd   : > { %s2121_s27 = smov [#allocation6]   ;;  %s1958_s5 = scalar_lea.hbm %s2717_s0, 512 }
   0xe   : > { %p1839_p9 = pneg %p2243_p8  ;;  %s167_s28 = sshll.u32 %s2121_s27, 4  ;;  %s2258_s28 = int_to_ptr.vmem [resolvable:$true] %s167_s28 }
   0xf   : > { %p1959_p12 = scmp.ne.s32.totalorder %s2717_s0, %s1958_s5  ;;  %p1965_p5 = scmp.lt.u32.totalorder %s1958_s5, %s2717_s0 }
  0x10   : > { %p2254_p11 = pnand %p1839_p9, %p2722_p1 }
  0x12   : > { %p1960_p13 = pneg %p2254_p11 }
  0x14   : > { %p1961_p0 = pnand %p1960_p13, %p1959_p12 }
  0x16   : > { %p1962_p3 = pneg %p1961_p0 }
  0x18   : > { %p1967_p7 = pnand %p1965_p5, %p1962_p3 }
  0x1a   : > { %1970 = shalt.err (!%p1967_p7)
}
  0x1b   : > { %s1971_s10 = scalar_lea.vmem %s2247_s25, 512  ;;  %p1979_p2 = scmp.lt.s32.totalorder %s2247_s25, %s2247_s25 }
  0x1c   : > { %p1972_p9 = scmp.ne.s32.totalorder %s2247_s25, %s1971_s10  ;;  %p1980_p12 = scmp.lt.s32.totalorder %s1971_s10, %s1971_s10 }
  0x1e   : > { %p1974_p10 = pnand %p1972_p9, %p1960_p13  ;;  %p1981_p0 = por %p1980_p12, %p1979_p2 }
  0x20   : > { %p1975_p1 = pneg %p1974_p10 }
  0x22   : > { %p1982_p6 = pnand %p1981_p0, %p1975_p1 }
  0x24   : > { %1985 = shalt.err (!%p1982_p6)
}
  0x25   : > { %s2122_s11 = smov 256   ;;  %s2123_s12 = smov 16  }
  0x26   : > { %1842 = dma.hbm_to_vmem [thread:$0]  (!%p2254_p11), %s2717_s0, 512, %s2247_s25, [#allocation4], %s2122_s11, %s2122_s11, %s2123_s12  }
  0x27   : > { %s1986_s27 = scalar_lea.hbm %s2719_s2, 1568 }
  0x28   : > { %p1987_p2 = scmp.ne.s32.totalorder %s2719_s2, %s1986_s27  ;;  %p1993_p10 = scmp.lt.u32.totalorder %s1986_s27, %s2719_s2 }
  0x2a   : > { %p1989_p1 = pnand %p1987_p2, %p1960_p13 }
  0x2c   : > { %p1990_p6 = pneg %p1989_p1 }
  0x2e   : > { %p1995_p3 = pnand %p1993_p10, %p1990_p6 }
  0x30   : > { %1998 = shalt.err (!%p1995_p3)
}
  0x31   : > { %s1999_s25 = scalar_lea.vmem %s2258_s28, 1568  ;;  %p2007_p12 = scmp.lt.s32.totalorder %s2258_s28, %s2258_s28 }
  0x32   : > { %p2000_p5 = scmp.ne.s32.totalorder %s2258_s28, %s1999_s25  ;;  %p2008_p0 = scmp.lt.s32.totalorder %s1999_s25, %s1999_s25 }
  0x34   : > { %p2002_p7 = pnand %p2000_p5, %p1960_p13  ;;  %p2009_p2 = por %p2008_p0, %p2007_p12 }
  0x36   : > { %p2003_p9 = pneg %p2002_p7 }
  0x38   : > { %p2010_p1 = pnand %p2009_p2, %p2003_p9 }
  0x3a   : > { %2013 = shalt.err (!%p2010_p1)
}
  0x3b   : > { %s2124_s7 = smov 32   ;;  %s2125_s8 = smov 2  }
  0x3c   : > { %1845 = dma.hbm_to_vmem [thread:$0]  (!%p2254_p11), %s2719_s2, 1568, %s2258_s28, [#allocation7], %s2124_s7, %s2124_s7, %s2125_s8  }
  0x3d   : > { %s2313_s11 = sadd.s32 1, %s2118_s18   ;;  %s89_s13 = sadd.s32 1, %s2114_s17 }
  0x3e   : > { %s86_s12 = ssub.s32 %s2118_s18, %s2313_s11  ;;  %p96_p6 = scmp.ne.s32.totalorder %s2114_s17, %s2110_s16 }
  0x3f   : > { %p87_p13 = scmp.eq.s32.totalorder %s86_s12, 0  ;;  %p97_p10 = scmp.eq.s32.totalorder %s2118_s18, 0 }
  0x40   : > { %p2729_p5 = scmp.eq.s32.totalorder %s2224_s19, 1  ;;  %p1856_p9 = scmp.lt.s32.totalorder %s2118_s18, 2 }
  0x41   : > { %s2322_s14 = scalar_select %p87_p13, %s2114_s17, %s89_s13  }
  0x42   : > { %p98_p3 = por %p97_p10, %p96_p6  ;;  %p2326_p7 = por %p2729_p5, %p96_p6 }
  0x43   : > { %s181_s26 = sand.u32 1, %s2118_s18   ;;  %s183_s24 = sand.u32 1, %s2114_s17  }
  0x44   : > { %s2730_s20 = scalar_select %p2326_p7, 1, 0 }
  0x45   : > { %s1798_s28 = sshll.u32 %s183_s24, 4  ;;  %s1817_s27 = sshll.u32 %s2118_s18, 8 }
  0x46   : > { %s2337_s5 = scalar_lea.hbm %s2720_s3, %s1817_s27  ;;  %s185_s6 = scalar_lea.vmem [#allocation8], %s1798_s28 }
  0x47   : > { %s193_s25 = sshll.u32 %s185_s6, 4  ;;  %p2339_p11 = pnand %p1856_p9, %p98_p3  ;;  %s2343_s25 = int_to_ptr.vmem [resolvable:$true] %s193_s25 }
  0x48   : > { %s182_s8 = scalar_lea.sflag [#allocation4], %s181_s26  ;;  %s2014_s9 = scalar_lea.hbm %s2337_s5, 256 }
  0x49   : > { %p2015_p12 = scmp.ne.s32.totalorder %s2337_s5, %s2014_s9  ;;  %p2016_p0 = pneg %p2339_p11 }
  0x4a   : > { %s2019_s13 = scalar_lea.hbm %s2720_s3, 512  ;;  %p2020_p13 = scmp.lt.u32.totalorder %s2337_s5, %s2720_s3 }
  0x4b   : > { %p2017_p2 = pnand %p2016_p0, %p2015_p12  ;;  %p2021_p6 = scmp.lt.u32.totalorder %s2019_s13, %s2014_s9 }
  0x4c   : > { %p2023_p3 = scmp.lt.u32.totalorder %s2014_s9, %s2337_s5 }
  0x4d   : > { %p2018_p1 = pneg %p2017_p2  ;;  %p2022_p10 = por %p2021_p6, %p2020_p13 }
  0x4f   : > { %p2024_p5 = por %p2023_p3, %p2022_p10 }
  0x51   : > { %p2025_p9 = pnand %p2024_p5, %p2018_p1 }
  0x53   : > { %2028 = shalt.err (!%p2025_p9)
}
  0x54   : > { %s2029_s26 = scalar_lea.vmem %s2343_s25, 256  ;;  %s2126_s27 = smov [#allocation8]  }
  0x55   : > { %p2030_p12 = scmp.ne.s32.totalorder %s2343_s25, %s2029_s26  ;;  %s2034_s29 = sshll.u32 %s2126_s27, 4  ;;  %s2035_s29 = int_to_ptr.vmem [resolvable:$false] %s2034_s29 }
  0x56   : > { %s2036_s30 = scalar_lea.vmem %s2035_s29, 512  ;;  %p2037_p4 = scmp.lt.s32.totalorder %s2343_s25, %s2035_s29 }
  0x57   : > { %p2032_p2 = pnand %p2030_p12, %p2016_p0  ;;  %p2038_p13 = scmp.lt.s32.totalorder %s2036_s30, %s2029_s26 }
  0x59   : > { %p2033_p7 = pneg %p2032_p2  ;;  %p2039_p6 = por %p2038_p13, %p2037_p4 }
  0x5b   : > { %p2040_p10 = pnand %p2039_p6, %p2033_p7 }
  0x5d   : > { %2043 = shalt.err (!%p2040_p10)
}
  0x5e   : > { %1849 = dma.hbm_to_vmem [thread:$0]  (!%p2339_p11), %s2337_s5, 256, %s2343_s25, %s182_s8  }
  0x5f   : > { %202 = sbr.rel (%p2243_p8) target bundleno = 658 (0x292), region = 36  ;;  %p2732_p0 = scmp.eq.s32.totalorder (!%p2243_p8), %s2224_s19, 0 }
  0x66   : > { %2089 = dma.done.wait (%p2732_p0), [#allocation4], 512   ;;  %p2733_p1 = pmov %p2732_p0 }
  0x67   : > { %p2734_p3 = pmov %p2732_p0 }
  0x68   : > { %2091 = vsyncadd (%p2733_p1), [#allocation4], 4294966784 }
  0x69   : > { %2093 = dma.done.wait (%p2734_p3), [#allocation7], 1568   ;;  %p2735_p4 = pmov %p2732_p0 }
  0x6a   : > { %s212_s6 = sand.u32 1, %s2224_s19   ;;  %s2382_s5 = sand.u32 1, %s2110_s16  }
  0x6b   : > { %2095 = vsyncadd (%p2735_p4), [#allocation7], 4294965728  ;;  %s1804_s23 = sshll.u32 %s2382_s5, 4  ;;  %s213_s25 = scalar_lea.sflag [#allocation4], %s212_s6 }
  0x6c   : > { %s2385_s7 = scalar_lea.vmem [#allocation8], %s1804_s23  ;;  %p2736_p8 = scmp.ne.s32.totalorder %s2725_s21, 0 }
  0x6e   : > { %2097 = dma.done.wait (%p2736_p8), %s213_s25, 256  }
  0x6f   : > { %2099 = vsyncadd (%p2736_p8), %s213_s25, 4294967040  ;;  %v2392_v0 = vld [vmem:[%s2385_s7] sm:$0xff]  ;;  %s2127_s8 = smov 50   ;;  %s2128_s9 = smov 51   ;;  %v2397_v1 = vld [vmem:[%s2385_s7 + $0x8] sm:$0xff]  ;;  %v248_v2 = vlaneseq }
  0x70   : > { %269 = vrot.lane.b32.xlu1 %v2392_v0, %s2127_s8  ;;  %244 = vrot.lane.b32.xlu0 %v2392_v0, %s2128_s9  ;;  %s2129_s10 = smov 49   ;;  %s2130_s21 = smov 48   ;;  %v277_v7 = vld [vmem:[#allocation6 + $0x2] sm:$0x3]  ;;  %v253_v8 = vld [vmem:[#allocation6] sm:$0x3] }
  0x71   : > { %s2131_s12 = smov 47   ;;  %s2132_s13 = smov 46   ;;  %v256_v3 = vshrl.u32 %v248_v2, 7  ;;  %v2455_v4 = vand.u32 127, %v248_v2  ;;  %v301_v23 = vld [vmem:[#allocation6 + $0x4] sm:$0x3] }
  0x72   : > { %s2133_s24 = smov 45   ;;  %s2134_s28 = smov 35   ;;  %v325_v26 = vld [vmem:[#allocation6 + $0x6] sm:$0x3]  ;;  %v349_v45 = vld [vmem:[#allocation6 + $0x8] sm:$0x3] }
  0x73   : > { %s2135_s26 = smov 34   ;;  %s2136_s27 = smov 33   ;;  %v2459_v5 = vsub.s32 0, %v256_v3  ;;  %v2461_v6 = vsub.s32 1, %v256_v3  ;;  %vm273_vm0 = vcmp.lt.s32.totalorder %v2455_v4, 50  ;;  %vm250_vm1 = vcmp.lt.s32.totalorder %v2455_v4, 51 }
  0x74   : > { %271 = vrot.lane.b32.xlu1 %v2397_v1, %s2127_s8  ;;  %246 = vrot.lane.b32.xlu0 %v2397_v1, %s2128_s9  ;;  %s2137_s29 = smov 32   ;;  %s2138_s30 = smov 31   ;;  %vm297_vm2 = vcmp.lt.s32.totalorder %v2455_v4, 49  ;;  %vm321_vm3 = vcmp.lt.s32.totalorder %v2455_v4, 48  ;;  %vm345_vm4 = vcmp.lt.s32.totalorder %v2455_v4, 47  ;;  %vm369_vm5 = vcmp.lt.s32.totalorder %v2455_v4, 46 }
  0x75   : > { %s2139_s6 = smov 30   ;;  %s2140_s23 = smov 29   ;;  %v282_v11 = vrot.slane %v277_v7, %v2459_v5  ;;  %v258_v12 = vrot.slane %v253_v8, %v2459_v5  ;;  %v262_v13 = vrot.slane %v253_v8, %v2461_v6  ;;  %v286_v14 = vrot.slane %v277_v7, %v2461_v6  ;;  %v373_v46 = vld [vmem:[#allocation6 + $0xa] sm:$0x3]  ;;  %v397_v3 = vld [vmem:[#allocation6 + $0xc] sm:$0x3] }
  0x76   : > { %s2141_s25 = smov 19   ;;  %s2142_s8 = smov 18   ;;  %v306_v30 = vrot.slane %v301_v23, %v2459_v5  ;;  %v310_v31 = vrot.slane %v301_v23, %v2461_v6  ;;  %v330_v34 = vrot.slane %v325_v26, %v2459_v5  ;;  %v334_v35 = vrot.slane %v325_v26, %v2461_v6  ;;  %v421_v7 = vld [vmem:[#allocation6 + $0xe] sm:$0x3]  ;;  %v445_v26 = vld [vmem:[#allocation6 + $0x10] sm:$0x3] }
  0x77   : > { %s2143_s9 = smov 111   ;;  %v354_v51 = vrot.slane %v349_v45, %v2459_v5  ;;  %v358_v52 = vrot.slane %v349_v45, %v2461_v6  ;;  %v378_v54 = vrot.slane %v373_v46, %v2459_v5  ;;  %v382_v55 = vrot.slane %v373_v46, %v2461_v6  ;;  %v493_v46 = vld [vmem:[#allocation6 + $0x14] sm:$0x3]  ;;  %p2737_p11 = scmp.ne.s32.totalorder %s2730_s20, 0 }
  0x78   : > { %295 = vrot.lane.b32.xlu1 %v2397_v1, %s2129_s10  ;;  %293 = vrot.lane.b32.xlu0 %v2392_v0, %s2129_s10  ;;  %s2144_s10 = smov 110   ;;  %vm393_vm6 = vcmp.lt.s32.totalorder %v2455_v4, 45  ;;  %vm417_vm7 = vcmp.lt.s32.totalorder %v2455_v4, 35  ;;  %vm441_vm8 = vcmp.lt.s32.totalorder %v2455_v4, 34  ;;  %vm465_vm9 = vcmp.lt.s32.totalorder %v2455_v4, 33 }
  0x79   : > { %vm489_vm10 = vcmp.lt.s32.totalorder %v2455_v4, 32  ;;  %vm513_vm11 = vcmp.lt.s32.totalorder %v2455_v4, 31  ;;  %vm537_vm12 = vcmp.lt.s32.totalorder %v2455_v4, 30  ;;  %vm561_vm13 = vcmp.lt.s32.totalorder %v2455_v4, 29 }
  0x7a   : > { %vm585_vm14 = vcmp.lt.s32.totalorder %v2455_v4, 19  ;;  %vm609_vm15 = vcmp.lt.s32.totalorder %v2455_v4, 18 }
  0x7c   : > { %319 = vrot.lane.b32.xlu1 %v2397_v1, %s2130_s21  ;;  %317 = vrot.lane.b32.xlu0 %v2392_v0, %s2130_s21  ;;  %s2145_s21 = smov 17  }
  0x80   : > { %343 = vrot.lane.b32.xlu1 %v2397_v1, %s2131_s12  ;;  %341 = vrot.lane.b32.xlu0 %v2392_v0, %s2131_s12  ;;  %s2146_s12 = smov 16  }
  0x84   : > { %367 = vrot.lane.b32.xlu1 %v2397_v1, %s2132_s13  ;;  %365 = vrot.lane.b32.xlu0 %v2392_v0, %s2132_s13  ;;  %s2147_s13 = smov 109  }
  0x88   : > { %391 = vrot.lane.b32.xlu1 %v2397_v1, %s2133_s24  ;;  %389 = vrot.lane.b32.xlu0 %v2392_v0, %s2133_s24  ;;  %s2148_s24 = smov 99  }
  0x8c   : > { %415 = vrot.lane.b32.xlu1 %v2397_v1, %s2134_s28  ;;  %413 = vrot.lane.b32.xlu0 %v2392_v0, %s2134_s28  ;;  %s2149_s28 = smov 15  }
  0x90   : > { %439 = vrot.lane.b32.xlu1 %v2397_v1, %s2135_s26  ;;  %437 = vrot.lane.b32.xlu0 %v2392_v0, %s2135_s26  ;;  %s2150_s26 = smov 14  }
  0x94   : > { %463 = vrot.lane.b32.xlu1 %v2397_v1, %s2136_s27  ;;  %461 = vrot.lane.b32.xlu0 %v2392_v0, %s2136_s27  ;;  %s2151_s27 = smov 98  }
  0x98   : > { %487 = vrot.lane.b32.xlu1 %v2397_v1, %s2137_s29  ;;  %485 = vrot.lane.b32.xlu0 %v2392_v0, %s2137_s29  ;;  %s2152_s29 = smov 97  }
  0x9c   : > { %511 = vrot.lane.b32.xlu1 %v2397_v1, %s2138_s30  ;;  %509 = vrot.lane.b32.xlu0 %v2392_v0, %s2138_s30  ;;  %s2153_s30 = smov 13  }
  0xa0   : > { %535 = vrot.lane.b32.xlu1 %v2397_v1, %s2139_s6  ;;  %533 = vrot.lane.b32.xlu0 %v2392_v0, %s2139_s6  ;;  %s2154_s6 = smov 3  }
  0xa4   : > { %559 = vrot.lane.b32.xlu1 %v2397_v1, %s2140_s23  ;;  %557 = vrot.lane.b32.xlu0 %v2392_v0, %s2140_s23  ;;  %s2155_s23 = smov 96  }
  0xa8   : > { %583 = vrot.lane.b32.xlu1 %v2397_v1, %s2141_s25  ;;  %581 = vrot.lane.b32.xlu0 %v2392_v0, %s2141_s25  ;;  %s2156_s25 = smov 95  }
  0xac   : > { %607 = vrot.lane.b32.xlu1 %v2397_v1, %s2142_s8  ;;  %605 = vrot.lane.b32.xlu0 %v2392_v0, %s2142_s8  ;;  %s2157_s8 = smov 2  }
  0xb0   : > { %993 = vrot.lane.b32.xlu1 %v2397_v1, %s2143_s9  ;;  %991 = vrot.lane.b32.xlu0 %v2392_v0, %s2143_s9  ;;  %s2158_s9 = smov 1  }
  0xb4   : > { %1017 = vrot.lane.b32.xlu1 %v2397_v1, %s2144_s10  ;;  %1015 = vrot.lane.b32.xlu0 %v2392_v0, %s2144_s10  ;;  %s2159_s10 = smov 94  }
  0xb8   : > { %631 = vrot.lane.b32.xlu1 %v2397_v1, %s2145_s21  ;;  %629 = vrot.lane.b32.xlu0 %v2392_v0, %s2145_s21  ;;  %s2160_s21 = smov 93  }
  0xbc   : > { %655 = vrot.lane.b32.xlu1 %v2397_v1, %s2146_s12  ;;  %653 = vrot.lane.b32.xlu0 %v2392_v0, %s2146_s12 }
  0xc0   : > { %1041 = vrot.lane.b32.xlu1 %v2397_v1, %s2147_s13  ;;  %1039 = vrot.lane.b32.xlu0 %v2392_v0, %s2147_s13  ;;  %s2161_s13 = smov 127  }
  0xc4   : > { %1065 = vrot.lane.b32.xlu1 %v2397_v1, %s2148_s24  ;;  %1063 = vrot.lane.b32.xlu0 %v2392_v0, %s2148_s24  ;;  %s2162_s24 = smov 83  }
  0xc8   : > { %679 = vrot.lane.b32.xlu1 %v2397_v1, %s2149_s28  ;;  %677 = vrot.lane.b32.xlu0 %v2392_v0, %s2149_s28  ;;  %s2163_s28 = smov 82  }
  0xcc   : > { %703 = vrot.lane.b32.xlu1 %v2397_v1, %s2150_s26  ;;  %701 = vrot.lane.b32.xlu0 %v2392_v0, %s2150_s26  ;;  %s2164_s26 = smov 126  }
  0xd0   : > { %1089 = vrot.lane.b32.xlu1 %v2397_v1, %s2151_s27  ;;  %1087 = vrot.lane.b32.xlu0 %v2392_v0, %s2151_s27  ;;  %s2165_s27 = smov 125  }
  0xd4   : > { %1113 = vrot.lane.b32.xlu1 %v2397_v1, %s2152_s29  ;;  %1111 = vrot.lane.b32.xlu0 %v2392_v0, %s2152_s29  ;;  %s2166_s29 = smov 81  }
  0xd8   : > { %727 = vrot.lane.b32.xlu1 %v2397_v1, %s2153_s30  ;;  %725 = vrot.lane.b32.xlu0 %v2392_v0, %s2153_s30  ;;  %s2167_s30 = smov 80  }
  0xdc   : > { %751 = vrot.lane.b32.xlu1 %v2397_v1, %s2154_s6  ;;  %749 = vrot.lane.b32.xlu0 %v2392_v0, %s2154_s6  ;;  %s2168_s6 = smov 115  }
  0xe0   : > { %1137 = vrot.lane.b32.xlu1 %v2397_v1, %s2155_s23  ;;  %1135 = vrot.lane.b32.xlu0 %v2392_v0, %s2155_s23  ;;  %s2169_s23 = smov 114  }
  0xe2   : > { %v270_v9 = vpop.permute.xlu1 %269  ;;  %v245_v10 = vpop.permute.xlu0 %244 }
  0xe4   : > { %1161 = vrot.lane.b32.xlu1 %v2397_v1, %s2156_s25  ;;  %1159 = vrot.lane.b32.xlu0 %v2392_v0, %s2156_s25  ;;  %s2170_s25 = smov 79  }
  0xe6   : > { %v272_v15 = vpop.permute.xlu1 %271  ;;  %v247_v16 = vpop.permute.xlu0 %246 }
  0xe7   : > { %v274_v17 = vsel %vm273_vm0, %v270_v9, %v272_v15  ;;  %v275_v18 = vsel %vm273_vm0, %v272_v15, %v270_v9  ;;  %v251_v19 = vsel %vm250_vm1, %v245_v10, %v247_v16  ;;  %v252_v20 = vsel %vm250_vm1, %v247_v16, %v245_v10 }
  0xe8   : > { %v289_v21 = vmul.f32 %v282_v11, %v275_v18  ;;  %v265_v22 = vmul.f32 %v258_v12, %v252_v20  ;;  %775 = vrot.lane.b32.xlu1 %v2397_v1, %s2157_s8  ;;  %773 = vrot.lane.b32.xlu0 %v2392_v0, %s2157_s8  ;;  %v266_v24 = vmul.f32 %v262_v13, %v251_v19  ;;  %s2171_s8 = smov 78   ;;  %vm995_vm0 = vcmp.lt.s32.totalorder %v2455_v4, 111 }
  0xe9   : > { %v290_v25 = vmul.f32 %v286_v14, %v274_v17  ;;  %v402_v12 = vrot.slane %v397_v3, %v2459_v5  ;;  %v406_v13 = vrot.slane %v397_v3, %v2461_v6  ;;  %v426_v15 = vrot.slane %v421_v7, %v2459_v5 }
  0xea   : > { %v296_v27 = vpop.permute.xlu1 %295  ;;  %v294_v28 = vpop.permute.xlu0 %293  ;;  %v1497_v29 = vpack.c.bf16 %v289_v21, %v265_v22  ;;  %v430_v16 = vrot.slane %v421_v7, %v2461_v6  ;;  %v541_v7 = vld [vmem:[#allocation6 + $0x18] sm:$0x3]  ;;  %vm1019_vm1 = vcmp.lt.s32.totalorder %v2455_v4, 110 }
  0xeb   : > { %v1498_v32 = vpack.c.bf16 %v290_v25, %v266_v24  ;;  %v299_v33 = vsel %vm297_vm2, %v296_v27, %v294_v28  ;;  %v298_v36 = vsel %vm297_vm2, %v294_v28, %v296_v27  ;;  %v469_v27 = vld [vmem:[#allocation6 + $0x12] sm:$0x3]  ;;  %vm1582_vm2 = vcmask 64512  }
  0xec   : > { %799 = vrot.lane.b32.xlu1 %v2397_v1, %s2158_s9  ;;  %797 = vrot.lane.b32.xlu0 %v2392_v0, %s2158_s9  ;;  %v313_v39 = vmul.f32 %v306_v30, %v299_v33  ;;  %v314_v42 = vmul.f32 %v310_v31, %v298_v36  ;;  %v454_v33 = vrot.slane %v445_v26, %v2461_v6  ;;  %s2172_s9 = smov 113  }
  0xed   : > { %1593 = vmatprep.subr.bf16.mxu1 %v1498_v32  ;;  %v450_v32 = vrot.slane %v445_v26, %v2459_v5  ;;  %v478_v36 = vrot.slane %v469_v27, %v2461_v6 }
  0xee   : > { %1594 = vmatpush1.bf16.msra.mxu1 %v1497_v29  ;;  %v320_v37 = vpop.permute.xlu1 %319  ;;  %v318_v38 = vpop.permute.xlu0 %317 }
  0xef   : > { %v322_v40 = vsel %vm321_vm3, %v318_v38, %v320_v37  ;;  %v323_v41 = vsel %vm321_vm3, %v320_v37, %v318_v38  ;;  %vm633_vm3 = vcmp.lt.s32.totalorder %v2455_v4, 17 }
  0xf0   : > { %v337_v43 = vmul.f32 %v330_v34, %v323_v41  ;;  %v338_v44 = vmul.f32 %v334_v35, %v322_v40  ;;  %1185 = vrot.lane.b32.xlu1 %v2397_v1, %s2159_s10  ;;  %1183 = vrot.lane.b32.xlu0 %v2392_v0, %s2159_s10  ;;  %v474_v35 = vrot.slane %v469_v27, %v2459_v5  ;;  %v589_v27 = vld [vmem:[#allocation6 + $0x1c] sm:$0x3]  ;;  %s2173_s10 = smov 112  }
  0xf2   : > { %v344_v47 = vpop.permute.xlu1 %343  ;;  %v342_v48 = vpop.permute.xlu0 %341  ;;  %v1500_v49 = vpack.c.bf16 %v338_v44, %v314_v42  ;;  %v1499_v50 = vpack.c.bf16 %v337_v43, %v313_v39 }
  0xf3   : > { %v347_v53 = vsel %vm345_vm4, %v344_v47, %v342_v48  ;;  %v346_v56 = vsel %vm345_vm4, %v342_v48, %v344_v47  ;;  %v517_v47 = vld [vmem:[#allocation6 + $0x16] sm:$0x3]  ;;  %vm657_vm4 = vcmp.lt.s32.totalorder %v2455_v4, 16 }
  0xf4   : > { %1209 = vrot.lane.b32.xlu1 %v2397_v1, %s2160_s21  ;;  %1207 = vrot.lane.b32.xlu0 %v2392_v0, %s2160_s21  ;;  %v361_v59 = vmul.f32 %v354_v51, %v347_v53  ;;  %v362_v62 = vmul.f32 %v358_v52, %v346_v56  ;;  %v498_v52 = vrot.slane %v493_v46, %v2459_v5  ;;  %s2175_s21 = smov 77  }
  0xf5   : > { %1595 = vmatprep.subr.bf16.mxu1 %v1500_v49  ;;  %v502_v53 = vrot.slane %v493_v46, %v2461_v6  ;;  %v526_v56 = vrot.slane %v517_v47, %v2461_v6 }
  0xf6   : > { %1596 = vmatpush1.bf16.msra.mxu1 %v1499_v50  ;;  %v368_v57 = vpop.permute.xlu1 %367  ;;  %v366_v58 = vpop.permute.xlu0 %365 }
  0xf7   : > { %v370_v60 = vsel %vm369_vm5, %v366_v58, %v368_v57  ;;  %v371_v61 = vsel %vm369_vm5, %v368_v57, %v366_v58  ;;  %vm1043_vm5 = vcmp.lt.s32.totalorder %v2455_v4, 109 }
  0xf8   : > { %v385_v63 = vmul.f32 %v378_v54, %v371_v61  ;;  %v386_v2 = vmul.f32 %v382_v55, %v370_v60  ;;  %825 = vrot.lane.b32.xlu1 %v2397_v1, %s2161_s13  ;;  %823 = vrot.lane.b32.xlu0 %v2392_v0, %s2161_s13  ;;  %v522_v55 = vrot.slane %v517_v47, %v2459_v5  ;;  %v999_v47 = vld [vmem:[#allocation6 + $0x40] sm:$0x3] }
  0xfa   : > { %v392_v8 = vpop.permute.xlu1 %391  ;;  %v390_v9 = vpop.permute.xlu0 %389  ;;  %v1502_v10 = vpack.c.bf16 %v386_v2, %v362_v62  ;;  %v1501_v11 = vpack.c.bf16 %v385_v63, %v361_v59 }
  0xfb   : > { %v395_v14 = vsel %vm393_vm6, %v392_v8, %v390_v9  ;;  %v394_v17 = vsel %vm393_vm6, %v390_v9, %v392_v8  ;;  %v565_v8 = vld [vmem:[#allocation6 + $0x1a] sm:$0x3]  ;;  %vm1067_vm6 = vcmp.lt.s32.totalorder %v2455_v4, 99 }
  0xfc   : > { %1233 = vrot.lane.b32.xlu1 %v2397_v1, %s2162_s24  ;;  %1231 = vrot.lane.b32.xlu0 %v2392_v0, %s2162_s24  ;;  %v409_v20 = vmul.f32 %v402_v12, %v395_v14  ;;  %v410_v23 = vmul.f32 %v406_v13, %v394_v17  ;;  %v546_v13 = vrot.slane %v541_v7, %v2459_v5 }
  0xfd   : > { %1597 = vmatprep.subr.bf16.mxu1 %v1502_v10  ;;  %v550_v14 = vrot.slane %v541_v7, %v2461_v6  ;;  %v574_v17 = vrot.slane %v565_v8, %v2461_v6 }
  0xfe   : > { %1598 = vmatpush1.bf16.msra.mxu1 %v1501_v11  ;;  %v416_v18 = vpop.permute.xlu1 %415  ;;  %v414_v19 = vpop.permute.xlu0 %413 }
  0xff   : > { %v418_v21 = vsel %vm417_vm7, %v414_v19, %v416_v18  ;;  %v419_v22 = vsel %vm417_vm7, %v416_v18, %v414_v19  ;;  %vm681_vm7 = vcmp.lt.s32.totalorder %v2455_v4, 15 }
 0x100   : > { %v433_v24 = vmul.f32 %v426_v15, %v419_v22  ;;  %v434_v25 = vmul.f32 %v430_v16, %v418_v21  ;;  %1257 = vrot.lane.b32.xlu1 %v2397_v1, %s2163_s28  ;;  %1255 = vrot.lane.b32.xlu0 %v2392_v0, %s2163_s28  ;;  %v570_v16 = vrot.slane %v565_v8, %v2459_v5  ;;  %v637_v8 = vld [vmem:[#allocation6 + $0x20] sm:$0x3] }
 0x102   : > { %v440_v28 = vpop.permute.xlu1 %439  ;;  %v438_v29 = vpop.permute.xlu0 %437  ;;  %v1504_v30 = vpack.c.bf16 %v434_v25, %v410_v23  ;;  %v1503_v31 = vpack.c.bf16 %v433_v24, %v409_v20 }
 0x103   : > { %v443_v34 = vsel %vm441_vm8, %v440_v28, %v438_v29  ;;  %v442_v37 = vsel %vm441_vm8, %v438_v29, %v440_v28  ;;  %v613_v28 = vld [vmem:[#allocation6 + $0x1e] sm:$0x3]  ;;  %vm705_vm8 = vcmp.lt.s32.totalorder %v2455_v4, 14 }
 0x104   : > { %849 = vrot.lane.b32.xlu1 %v2397_v1, %s2164_s26  ;;  %847 = vrot.lane.b32.xlu0 %v2392_v0, %s2164_s26  ;;  %v457_v40 = vmul.f32 %v450_v32, %v443_v34  ;;  %v458_v43 = vmul.f32 %v454_v33, %v442_v37  ;;  %v594_v33 = vrot.slane %v589_v27, %v2459_v5 }
 0x105   : > { %1599 = vmatprep.subr.bf16.mxu1 %v1504_v30  ;;  %v598_v34 = vrot.slane %v589_v27, %v2461_v6  ;;  %v622_v37 = vrot.slane %v613_v28, %v2461_v6 }
 0x106   : > { %1600 = vmatpush1.bf16.msra.mxu1 %v1503_v31  ;;  %v464_v38 = vpop.permute.xlu1 %463  ;;  %v462_v39 = vpop.permute.xlu0 %461 }
 0x107   : > { %v466_v41 = vsel %vm465_vm9, %v462_v39, %v464_v38  ;;  %v467_v42 = vsel %vm465_vm9, %v464_v38, %v462_v39  ;;  %vm1091_vm9 = vcmp.lt.s32.totalorder %v2455_v4, 98 }
 0x108   : > { %v481_v44 = vmul.f32 %v474_v35, %v467_v42  ;;  %v482_v45 = vmul.f32 %v478_v36, %v466_v41  ;;  %873 = vrot.lane.b32.xlu1 %v2397_v1, %s2165_s27  ;;  %871 = vrot.lane.b32.xlu0 %v2392_v0, %s2165_s27  ;;  %v618_v36 = vrot.slane %v613_v28, %v2459_v5 }
 0x10a   : > { %v488_v48 = vpop.permute.xlu1 %487  ;;  %v486_v49 = vpop.permute.xlu0 %485  ;;  %v1506_v50 = vpack.c.bf16 %v482_v45, %v458_v43  ;;  %v1505_v51 = vpack.c.bf16 %v481_v44, %v457_v40 }
 0x10b   : > { %v491_v54 = vsel %vm489_vm10, %v488_v48, %v486_v49  ;;  %v490_v57 = vsel %vm489_vm10, %v486_v49, %v488_v48  ;;  %v1023_v48 = vld [vmem:[#allocation6 + $0x42] sm:$0x3]  ;;  %vm1115_vm10 = vcmp.lt.s32.totalorder %v2455_v4, 97 }
 0x10c   : > { %1281 = vrot.lane.b32.xlu1 %v2397_v1, %s2166_s29  ;;  %1279 = vrot.lane.b32.xlu0 %v2392_v0, %s2166_s29  ;;  %v505_v60 = vmul.f32 %v498_v52, %v491_v54  ;;  %v506_v63 = vmul.f32 %v502_v53, %v490_v57  ;;  %v1952_v53 = vld [vmem:[#allocation3 + $0x4] ss:$16 sps:$4 sm:$0xff]   ;;  %v1004_v54 = vrot.slane %v999_v47, %v2459_v5 }
 0x10d   : > { %1601 = vmatprep.subr.bf16.mxu1 %v1506_v50  ;;  %v1028_v57 = vrot.slane %v1023_v48, %v2459_v5  ;;  %1625 = vmatprep.mubr.bf16.mxu1 %v1952_v53 }
 0x10e   : > { %1602 = vmatpush1.bf16.msra.mxu1 %v1505_v51  ;;  %v512_v58 = vpop.permute.xlu1 %511  ;;  %v510_v59 = vpop.permute.xlu0 %509 }
 0x10f   : > { %v514_v61 = vsel %vm513_vm11, %v510_v59, %v512_v58  ;;  %v515_v62 = vsel %vm513_vm11, %v512_v58, %v510_v59  ;;  %v1032_v58 = vrot.slane %v1023_v48, %v2461_v6  ;;  %vm729_vm11 = vcmp.lt.s32.totalorder %v2455_v4, 13 }
 0x110   : > { %v529_v2 = vmul.f32 %v522_v55, %v515_v62  ;;  %v530_v3 = vmul.f32 %v526_v56, %v514_v61  ;;  %1305 = vrot.lane.b32.xlu1 %v2397_v1, %s2167_s30  ;;  %1303 = vrot.lane.b32.xlu0 %v2392_v0, %s2167_s30  ;;  %v1008_v55 = vrot.slane %v999_v47, %v2461_v6  ;;  %s1818_s30 = sshll.u32 %s2224_s19, 9 }
 0x112   : > { %v536_v9 = vpop.permute.xlu1 %535  ;;  %v534_v10 = vpop.permute.xlu0 %533  ;;  %v1508_v11 = vpack.c.bf16 %v530_v3, %v506_v63  ;;  %v1507_v12 = vpack.c.bf16 %v529_v2, %v505_v60  ;;  %v1955_v60 = vld [vmem:[#allocation3 + $0xc] ss:$16 sps:$4 sm:$0xff]  }
 0x113   : > { %v539_v15 = vsel %vm537_vm12, %v536_v9, %v534_v10  ;;  %v538_v18 = vsel %vm537_vm12, %v534_v10, %v536_v9  ;;  %1811 = vmatprep.mubr.msk.bf16.mxu0 %vm1582_vm2, %v1955_v60  ;;  %vm753_vm12 = vcmp.lt.s32.totalorder %v2455_v4, 3  ;;  %vm1211_vm2 = vcmp.lt.s32.totalorder %v2455_v4, 93 }
 0x114   : > { %897 = vrot.lane.b32.xlu1 %v2397_v1, %s2168_s6  ;;  %895 = vrot.lane.b32.xlu0 %v2392_v0, %s2168_s6  ;;  %v553_v21 = vmul.f32 %v546_v13, %v539_v15  ;;  %v554_v24 = vmul.f32 %v550_v14, %v538_v18  ;;  %v646_v18 = vrot.slane %v637_v8, %v2461_v6 }
 0x115   : > { %1603 = vmatprep.subr.bf16.mxu1 %v1508_v11  ;;  %v661_v11 = vld [vmem:[#allocation6 + $0x22] sm:$0x3] }
 0x116   : > { %1604 = vmatpush1.bf16.msra.mxu1 %v1507_v12  ;;  %v560_v19 = vpop.permute.xlu1 %559  ;;  %v558_v20 = vpop.permute.xlu0 %557  ;;  %v2174_v12 = vmov 0  }
 0x117   : > { %v562_v22 = vsel %vm561_vm13, %v558_v20, %v560_v19  ;;  %v563_v23 = vsel %vm561_vm13, %v560_v19, %v558_v20  ;;  %1949 = vset.pattern.permute.xlu1 %v2174_v12  ;;  %1948 = vset.pattern.permute.xlu0 %v2174_v12  ;;  %v666_v20 = vrot.slane %v661_v11, %v2459_v5  ;;  %v1095_v12 = vld [vmem:[#allocation6 + $0x48] sm:$0x3]  ;;  %vm1139_vm13 = vcmp.lt.s32.totalorder %v2455_v4, 96 }
 0x118   : > { %v577_v25 = vmul.f32 %v570_v16, %v563_v23  ;;  %v578_v26 = vmul.f32 %v574_v17, %v562_v22  ;;  %921 = vrot.lane.b32.xlu1 %v2397_v1, %s2169_s23  ;;  %919 = vrot.lane.b32.xlu0 %v2392_v0, %s2169_s23  ;;  %v642_v17 = vrot.slane %v637_v8, %v2459_v5  ;;  %v1552_v23 = vld [vmem:[%s2718_s1 + $0x8] sm:$0xff] }
 0x11a   : > { %v584_v29 = vpop.permute.xlu1 %583  ;;  %v582_v30 = vpop.permute.xlu0 %581  ;;  %v1510_v31 = vpack.c.bf16 %v578_v26, %v554_v24  ;;  %v1509_v32 = vpack.c.bf16 %v577_v25, %v553_v21  ;;  %v670_v21 = vrot.slane %v661_v11, %v2461_v6 }
 0x11b   : > { %v587_v35 = vsel %vm585_vm14, %v584_v29, %v582_v30  ;;  %v586_v38 = vsel %vm585_vm14, %v582_v30, %v584_v29  ;;  %vm1163_vm14 = vcmp.lt.s32.totalorder %v2455_v4, 95 }
 0x11c   : > { %1329 = vrot.lane.b32.xlu1 %v2397_v1, %s2170_s25  ;;  %1327 = vrot.lane.b32.xlu0 %v2392_v0, %s2170_s25  ;;  %v601_v41 = vmul.f32 %v594_v33, %v587_v35  ;;  %v602_v44 = vmul.f32 %v598_v34, %v586_v38  ;;  %s2672_s25 = scalar_lea.hbm %s2721_s4, %s1818_s30 }
 0x11d   : > { %1605 = vmatprep.subr.bf16.mxu1 %v1510_v31  ;;  %v1047_v31 = vld [vmem:[#allocation6 + $0x44] sm:$0x3] }
 0x11e   : > { %1606 = vmatpush1.bf16.msra.mxu1 %v1509_v32  ;;  %v608_v39 = vpop.permute.xlu1 %607  ;;  %v606_v40 = vpop.permute.xlu0 %605  ;;  %v1071_v32 = vld [vmem:[#allocation6 + $0x46] sm:$0x3]  ;;  %v1056_v38 = vrot.slane %v1047_v31, %v2461_v6 }
 0x11f   : > { %v610_v42 = vsel %vm609_vm15, %v606_v40, %v608_v39  ;;  %v611_v43 = vsel %vm609_vm15, %v608_v39, %v606_v40  ;;  %v1076_v39 = vrot.slane %v1071_v32, %v2459_v5  ;;  %v1080_v40 = vrot.slane %v1071_v32, %v2461_v6 }
 0x120   : > { %v625_v45 = vmul.f32 %v618_v36, %v611_v43  ;;  %v626_v46 = vmul.f32 %v622_v37, %v610_v42  ;;  %1353 = vrot.lane.b32.xlu1 %v2397_v1, %s2171_s8  ;;  %1351 = vrot.lane.b32.xlu0 %v2392_v0, %s2171_s8  ;;  %v1052_v37 = vrot.slane %v1047_v31, %v2459_v5  ;;  %v757_v31 = vld [vmem:[#allocation6 + $0x2a] sm:$0x3]  ;;  %vm777_vm15 = vcmp.lt.s32.totalorder %v2455_v4, 2  ;;  %s1688_s8 = scalar_lea.sflag [#allocation5], %s2382_s5 }
 0x122   : > { %v994_v49 = vpop.permute.xlu1 %993  ;;  %v992_v50 = vpop.permute.xlu0 %991  ;;  %v1512_v51 = vpack.c.bf16 %v626_v46, %v602_v44  ;;  %v1511_v52 = vpack.c.bf16 %v625_v45, %v601_v41 }
 0x123   : > { %v996_v56 = vsel %vm995_vm0, %v992_v50, %v994_v49  ;;  %v997_v59 = vsel %vm995_vm0, %v994_v49, %v992_v50  ;;  %vm801_vm0 = vcmp.lt.s32.totalorder %v2455_v4, 1 }
 0x124   : > { %945 = vrot.lane.b32.xlu1 %v2397_v1, %s2172_s9  ;;  %943 = vrot.lane.b32.xlu0 %v2392_v0, %s2172_s9  ;;  %v1011_v63 = vmul.f32 %v1004_v54, %v996_v56  ;;  %v1012_v9 = vmul.f32 %v1008_v55, %v997_v59  ;;  %s2176_s9 = smov [#allocation9]  }
 0x125   : > { %1607 = vmatprep.subr.bf16.mxu1 %v1512_v51  ;;  %v685_v51 = vld [vmem:[#allocation6 + $0x24] sm:$0x3] }
 0x126   : > { %1608 = vmatpush1.bf16.msra.mxu1 %v1511_v52  ;;  %v1018_v61 = vpop.permute.xlu1 %1017  ;;  %v1016_v62 = vpop.permute.xlu0 %1015  ;;  %v709_v52 = vld [vmem:[#allocation6 + $0x26] sm:$0x3] }
 0x127   : > { %v1020_v2 = vsel %vm1019_vm1, %v1016_v62, %v1018_v61  ;;  %v1021_v3 = vsel %vm1019_vm1, %v1018_v61, %v1016_v62  ;;  %v714_v59 = vrot.slane %v709_v52, %v2459_v5  ;;  %v718_v60 = vrot.slane %v709_v52, %v2461_v6 }
 0x128   : > { %v1035_v7 = vmul.f32 %v1028_v57, %v1020_v2  ;;  %969 = vrot.lane.b32.xlu1 %v2397_v1, %s2173_s10  ;;  %967 = vrot.lane.b32.xlu0 %v2392_v0, %s2173_s10  ;;  %v1036_v10 = vmul.f32 %v1032_v58, %v1021_v3  ;;  %v690_v57 = vrot.slane %v685_v51, %v2459_v5  ;;  %vm1187_vm1 = vcmp.lt.s32.totalorder %v2455_v4, 94  ;;  %s2048_s10 = sshll.u32 %s2176_s9, 4  ;;  %s2049_s10 = int_to_ptr.vmem [resolvable:$false] %s2048_s10 }
 0x129   : > { %v694_v58 = vrot.slane %v685_v51, %v2461_v6  ;;  %v1167_v51 = vld [vmem:[#allocation6 + $0x4e] sm:$0x3] }
 0x12a   : > { %v632_v13 = vpop.permute.xlu1 %631  ;;  %v630_v14 = vpop.permute.xlu0 %629  ;;  %v1530_v15 = vpack.c.bf16 %v1036_v10, %v1012_v9  ;;  %v1529_v16 = vpack.c.bf16 %v1035_v7, %v1011_v63 }
 0x12b   : > { %v635_v19 = vsel %vm633_vm3, %v632_v13, %v630_v14  ;;  %v634_v22 = vsel %vm633_vm3, %v630_v14, %v632_v13  ;;  %v1119_v13 = vld [vmem:[#allocation6 + $0x4a] sm:$0x3]  ;;  %vm827_vm3 = vcmp.lt.s32.totalorder %v2455_v4, 127 }
 0x12c   : > { %1377 = vrot.lane.b32.xlu1 %v2397_v1, %s2175_s21  ;;  %1375 = vrot.lane.b32.xlu0 %v2392_v0, %s2175_s21  ;;  %v1551_v1 = vld [vmem:[%s2718_s1] sm:$0xff]  ;;  %v649_v25 = vmul.f32 %v642_v17, %v635_v19  ;;  %v650_v28 = vmul.f32 %v646_v18, %v634_v22  ;;  %v1100_v18 = vrot.slane %v1095_v12, %v2459_v5  ;;  %s2050_s21 = scalar_lea.vmem %s2049_s10, 1024 }
 0x12d   : > { %1636 = vmatprep.subr.bf16.mxu0 %v1530_v15  ;;  %v1104_v19 = vrot.slane %v1095_v12, %v2461_v6  ;;  %v805_v12 = vld [vmem:[#allocation6 + $0x2e] sm:$0x3] }
 0x12e   : > { %1637 = vmatpush1.bf16.msra.mxu0 %v1529_v16  ;;  %v656_v0 = vpop.permute.xlu1 %655  ;;  %v654_v24 = vpop.permute.xlu0 %653 }
 0x12f   : > { %v658_v26 = vsel %vm657_vm4, %v654_v24, %v656_v0  ;;  %v659_v27 = vsel %vm657_vm4, %v656_v0, %v654_v24  ;;  %vm1235_vm4 = vcmp.lt.s32.totalorder %v2455_v4, 83 }
 0x130   : > { %v673_v29 = vmul.f32 %v666_v20, %v659_v27  ;;  %v674_v30 = vmul.f32 %v670_v21, %v658_v26  ;;  %1560 = vperm.xlu1 %1949, %v1552_v23   ;;  %1555 = vperm.xlu0 %1948, %v1551_v1   ;;  %v1124_v20 = vrot.slane %v1119_v13, %v2459_v5 }
 0x131   : > { %v1128_v21 = vrot.slane %v1119_v13, %v2461_v6 }
 0x132   : > { %v1042_v33 = vpop.permute.xlu1 %1041  ;;  %v1040_v34 = vpop.permute.xlu0 %1039  ;;  %v1514_v35 = vpack.c.bf16 %v674_v30, %v650_v28  ;;  %v1513_v36 = vpack.c.bf16 %v673_v29, %v649_v25  ;;  %v733_v30 = vld [vmem:[#allocation6 + $0x28] sm:$0x3] }
 0x133   : > { %v1044_v41 = vsel %vm1043_vm5, %v1040_v34, %v1042_v33  ;;  %v1045_v42 = vsel %vm1043_vm5, %v1042_v33, %v1040_v34  ;;  %vm1259_vm5 = vcmp.lt.s32.totalorder %v2455_v4, 82 }
 0x134   : > { %1609 = vmatprep.subr.bf16.mxu1 %v1514_v35  ;;  %v1059_v47 = vmul.f32 %v1052_v37, %v1044_v41  ;;  %v1060_v48 = vmul.f32 %v1056_v38, %v1045_v42  ;;  %v742_v37 = vrot.slane %v733_v30, %v2461_v6  ;;  %v762_v38 = vrot.slane %v757_v31, %v2459_v5 }
 0x135   : > { %1610 = vmatpush1.bf16.msra.mxu1 %v1513_v36  ;;  %v738_v36 = vrot.slane %v733_v30, %v2459_v5  ;;  %v1215_v30 = vld [vmem:[#allocation6 + $0x52] sm:$0x3] }
 0x136   : > { %v1066_v43 = vpop.permute.xlu1 %1065  ;;  %v1064_v44 = vpop.permute.xlu0 %1063 }
 0x137   : > { %v1068_v45 = vsel %vm1067_vm6, %v1064_v44, %v1066_v43  ;;  %v1069_v46 = vsel %vm1067_vm6, %v1066_v43, %v1064_v44  ;;  %vm851_vm6 = vcmp.lt.s32.totalorder %v2455_v4, 126 }
 0x138   : > { %v1083_v49 = vmul.f32 %v1076_v39, %v1068_v45  ;;  %v1084_v50 = vmul.f32 %v1080_v40, %v1069_v46  ;;  %v766_v39 = vrot.slane %v757_v31, %v2461_v6 }
 0x13a   : > { %v680_v53 = vpop.permute.xlu1 %679  ;;  %v678_v54 = vpop.permute.xlu0 %677  ;;  %v1532_v55 = vpack.c.bf16 %v1084_v50, %v1060_v48  ;;  %v1531_v56 = vpack.c.bf16 %v1083_v49, %v1059_v47  ;;  %v1143_v50 = vld [vmem:[#allocation6 + $0x4c] sm:$0x3] }
 0x13b   : > { %v682_v61 = vsel %vm681_vm7, %v678_v54, %v680_v53  ;;  %v683_v62 = vsel %vm681_vm7, %v680_v53, %v678_v54  ;;  %vm875_vm7 = vcmp.lt.s32.totalorder %v2455_v4, 125 }
 0x13c   : > { %1638 = vmatprep.subr.bf16.mxu0 %v1532_v55  ;;  %v697_v8 = vmul.f32 %v690_v57, %v683_v62  ;;  %v698_v9 = vmul.f32 %v694_v58, %v682_v61  ;;  %v1152_v57 = vrot.slane %v1143_v50, %v2461_v6  ;;  %v1172_v58 = vrot.slane %v1167_v51, %v2459_v5 }
 0x13d   : > { %1639 = vmatpush1.bf16.msra.mxu0 %v1531_v56  ;;  %v1148_v56 = vrot.slane %v1143_v50, %v2459_v5 }
 0x13e   : > { %v704_v63 = vpop.permute.xlu1 %703  ;;  %v702_v2 = vpop.permute.xlu0 %701 }
 0x13f   : > { %v706_v3 = vsel %vm705_vm8, %v702_v2, %v704_v63  ;;  %v707_v7 = vsel %vm705_vm8, %v704_v63, %v702_v2  ;;  %vm1283_vm8 = vcmp.lt.s32.totalorder %v2455_v4, 81 }
 0x140   : > { %v721_v10 = vmul.f32 %v714_v59, %v707_v7  ;;  %v722_v11 = vmul.f32 %v718_v60, %v706_v3  ;;  %v1176_v59 = vrot.slane %v1167_v51, %v2461_v6 }
 0x142   : > { %v1090_v14 = vpop.permute.xlu1 %1089  ;;  %v1088_v15 = vpop.permute.xlu0 %1087  ;;  %v1516_v16 = vpack.c.bf16 %v722_v11, %v698_v9  ;;  %v1515_v17 = vpack.c.bf16 %v721_v10, %v697_v8  ;;  %v781_v11 = vld [vmem:[#allocation6 + $0x2c] sm:$0x3] }
 0x143   : > { %v1092_v22 = vsel %vm1091_vm9, %v1088_v15, %v1090_v14  ;;  %v1093_v23 = vsel %vm1091_vm9, %v1090_v14, %v1088_v15  ;;  %vm1307_vm9 = vcmp.lt.s32.totalorder %v2455_v4, 80 }
 0x144   : > { %1611 = vmatprep.subr.bf16.mxu1 %v1516_v16  ;;  %v1107_v26 = vmul.f32 %v1100_v18, %v1092_v22  ;;  %v1108_v27 = vmul.f32 %v1104_v19, %v1093_v23  ;;  %v790_v18 = vrot.slane %v781_v11, %v2461_v6  ;;  %v810_v19 = vrot.slane %v805_v12, %v2459_v5 }
 0x145   : > { %1612 = vmatpush1.bf16.msra.mxu1 %v1515_v17  ;;  %v786_v17 = vrot.slane %v781_v11, %v2459_v5 }
 0x146   : > { %v1114_v1 = vpop.permute.xlu1 %1113  ;;  %v1112_v0 = vpop.permute.xlu0 %1111 }
 0x147   : > { %v1116_v24 = vsel %vm1115_vm10, %v1112_v0, %v1114_v1  ;;  %v1117_v25 = vsel %vm1115_vm10, %v1114_v1, %v1112_v0  ;;  %vm899_vm10 = vcmp.lt.s32.totalorder %v2455_v4, 115 }
 0x148   : > { %v1131_v28 = vmul.f32 %v1124_v20, %v1116_v24  ;;  %v1132_v29 = vmul.f32 %v1128_v21, %v1117_v25  ;;  %v814_v20 = vrot.slane %v805_v12, %v2461_v6 }
 0x14a   : > { %v728_v32 = vpop.permute.xlu1 %727  ;;  %v726_v33 = vpop.permute.xlu0 %725  ;;  %v1534_v34 = vpack.c.bf16 %v1132_v29, %v1108_v27  ;;  %v1533_v35 = vpack.c.bf16 %v1131_v28, %v1107_v26  ;;  %v1191_v29 = vld [vmem:[#allocation6 + $0x50] sm:$0x3] }
 0x14b   : > { %v730_v40 = vsel %vm729_vm11, %v726_v33, %v728_v32  ;;  %v731_v41 = vsel %vm729_vm11, %v728_v32, %v726_v33  ;;  %vm923_vm11 = vcmp.lt.s32.totalorder %v2455_v4, 114 }
 0x14c   : > { %1640 = vmatprep.subr.bf16.mxu0 %v1534_v34  ;;  %v745_v46 = vmul.f32 %v738_v36, %v731_v41  ;;  %v746_v47 = vmul.f32 %v742_v37, %v730_v40  ;;  %v1200_v36 = vrot.slane %v1191_v29, %v2461_v6  ;;  %v1220_v37 = vrot.slane %v1215_v30, %v2459_v5 }
 0x14d   : > { %1641 = vmatpush1.bf16.msra.mxu0 %v1533_v35  ;;  %v1196_v35 = vrot.slane %v1191_v29, %v2459_v5 }
 0x14e   : > { %v752_v42 = vpop.permute.xlu1 %751  ;;  %v750_v43 = vpop.permute.xlu0 %749 }
 0x14f   : > { %v754_v44 = vsel %vm753_vm12, %v750_v43, %v752_v42  ;;  %v755_v45 = vsel %vm753_vm12, %v752_v42, %v750_v43  ;;  %vm1331_vm12 = vcmp.lt.s32.totalorder %v2455_v4, 79 }
 0x150   : > { %v769_v48 = vmul.f32 %v762_v38, %v755_v45  ;;  %v770_v49 = vmul.f32 %v766_v39, %v754_v44  ;;  %v1224_v38 = vrot.slane %v1215_v30, %v2461_v6  ;;  %v831_v39 = vld [vmem:[#allocation6 + $0x32] sm:$0x3] }
 0x152   : > { %v1138_v52 = vpop.permute.xlu1 %1137  ;;  %v1136_v53 = vpop.permute.xlu0 %1135  ;;  %v1518_v54 = vpack.c.bf16 %v770_v49, %v746_v47  ;;  %v1517_v55 = vpack.c.bf16 %v769_v48, %v745_v46  ;;  %v836_v46 = vrot.slane %v831_v39, %v2459_v5  ;;  %v840_v47 = vrot.slane %v831_v39, %v2461_v6 }
 0x153   : > { %v1140_v60 = vsel %vm1139_vm13, %v1136_v53, %v1138_v52  ;;  %v1141_v61 = vsel %vm1139_vm13, %v1138_v52, %v1136_v53  ;;  %vm1355_vm13 = vcmp.lt.s32.totalorder %v2455_v4, 78 }
 0x154   : > { %1613 = vmatprep.subr.bf16.mxu1 %v1518_v54  ;;  %v1155_v7 = vmul.f32 %v1148_v56, %v1140_v60  ;;  %v1156_v8 = vmul.f32 %v1152_v57, %v1141_v61  ;;  %v1239_v60 = vld [vmem:[#allocation6 + $0x54] sm:$0x3]  ;;  %v1263_v61 = vld [vmem:[#allocation6 + $0x56] sm:$0x3] }
 0x155   : > { %1614 = vmatpush1.bf16.msra.mxu1 %v1517_v55  ;;  %v1268_v11 = vrot.slane %v1263_v61, %v2459_v5  ;;  %v1272_v12 = vrot.slane %v1263_v61, %v2461_v6  ;;  %v903_v61 = vld [vmem:[#allocation6 + $0x38] sm:$0x3] }
 0x156   : > { %v1162_v62 = vpop.permute.xlu1 %1161  ;;  %v1160_v63 = vpop.permute.xlu0 %1159 }
 0x157   : > { %v1164_v2 = vsel %vm1163_vm14, %v1160_v63, %v1162_v62  ;;  %v1165_v3 = vsel %vm1163_vm14, %v1162_v62, %v1160_v63  ;;  %vm947_vm14 = vcmp.lt.s32.totalorder %v2455_v4, 113 }
 0x158   : > { %v1179_v9 = vmul.f32 %v1172_v58, %v1164_v2  ;;  %v1180_v10 = vmul.f32 %v1176_v59, %v1165_v3  ;;  %v1956_v2 = vld [vmem:[%s2385_s7 + $0x8] sm:$0xff] }
 0x15a   : > { %v776_v13 = vpop.permute.xlu1 %775  ;;  %v774_v14 = vpop.permute.xlu0 %773  ;;  %v1536_v15 = vpack.c.bf16 %v1180_v10, %v1156_v8  ;;  %v1535_v16 = vpack.c.bf16 %v1179_v9, %v1155_v7  ;;  %v1957_v7 = vld [vmem:[%s2385_s7] sm:$0xff]  ;;  %v1244_v9 = vrot.slane %v1239_v60, %v2459_v5  ;;  %v1248_v10 = vrot.slane %v1239_v60, %v2461_v6  ;;  %s1805_s7 = sshll.u32 %s2382_s5, 5 }
 0x15b   : > { %v778_v21 = vsel %vm777_vm15, %v774_v14, %v776_v13  ;;  %v779_v22 = vsel %vm777_vm15, %v776_v13, %v774_v14  ;;  %vm971_vm15 = vcmp.lt.s32.totalorder %v2455_v4, 112  ;;  %s240_s27 = scalar_lea.vmem [#allocation9], %s1805_s7 }
 0x15c   : > { %1642 = vmatprep.subr.bf16.mxu0 %v1536_v15  ;;  %v793_v25 = vmul.f32 %v786_v17, %v779_v22  ;;  %v794_v26 = vmul.f32 %v790_v18, %v778_v21  ;;  %s1701_s29 = sshll.u32 %s240_s27, 4  ;;  %s2667_s29 = int_to_ptr.vmem [resolvable:$true] %s1701_s29 }
 0x15d   : > { %1643 = vmatpush1.bf16.msra.mxu0 %v1535_v16  ;;  %s2044_s19 = scalar_lea.vmem %s2667_s29, 512  ;;  %p2051_p12 = scmp.lt.s32.totalorder %s2667_s29, %s2049_s10 }
 0x15e   : > { %v800_v23 = vpop.permute.xlu1 %799  ;;  %v798_v1 = vpop.permute.xlu0 %797  ;;  %p2045_p7 = scmp.ne.s32.totalorder %s2667_s29, %s2044_s19  ;;  %p2052_p2 = scmp.lt.s32.totalorder %s2050_s21, %s2044_s19 }
 0x15f   : > { %v802_v0 = vsel %vm801_vm0, %v798_v1, %v800_v23  ;;  %v803_v24 = vsel %vm801_vm0, %v800_v23, %v798_v1  ;;  %v855_v23 = vld [vmem:[#allocation6 + $0x34] sm:$0x3]  ;;  %v879_v1 = vld [vmem:[#allocation6 + $0x36] sm:$0x3]  ;;  %vm1379_vm0 = vcmp.lt.s32.totalorder %v2455_v4, 77 }
 0x160   : > { %v817_v27 = vmul.f32 %v810_v19, %v803_v24  ;;  %v818_v28 = vmul.f32 %v814_v20, %v802_v0  ;;  %v884_v29 = vrot.slane %v879_v1, %v2459_v5  ;;  %v888_v30 = vrot.slane %v879_v1, %v2461_v6  ;;  %v1950_v4 = vld [vmem:[#allocation3] ss:$16 sps:$4 sm:$0xff]   ;;  %p2046_p5 = pnand %p2045_p7, %p2737_p11  ;;  %p2053_p13 = por %p2052_p2, %p2051_p12 }
 0x162   : > { %v1186_v31 = vpop.permute.xlu1 %1185  ;;  %v1184_v32 = vpop.permute.xlu0 %1183  ;;  %v1520_v33 = vpack.c.bf16 %v818_v28, %v794_v26  ;;  %v1519_v34 = vpack.c.bf16 %v817_v27, %v793_v25  ;;  %v860_v27 = vrot.slane %v855_v23, %v2459_v5  ;;  %v864_v28 = vrot.slane %v855_v23, %v2461_v6  ;;  %v1359_v23 = vld [vmem:[#allocation6 + $0x5e] sm:$0x3]  ;;  %p2047_p9 = pneg %p2046_p5 }
 0x163   : > { %v1188_v40 = vsel %vm1187_vm1, %v1184_v32, %v1186_v31  ;;  %v1189_v41 = vsel %vm1187_vm1, %v1186_v31, %v1184_v32  ;;  %vm1586_vm1 = vcmask 1043456  }
 0x164   : > { %1615 = vmatprep.subr.bf16.mxu1 %v1520_v33  ;;  %v1203_v48 = vmul.f32 %v1196_v35, %v1188_v40  ;;  %v1204_v49 = vmul.f32 %v1200_v36, %v1189_v41  ;;  %v1287_v41 = vld [vmem:[#allocation6 + $0x58] sm:$0x3]  ;;  %p2054_p6 = pnand %p2053_p13, %p2047_p9 }
 0x165   : > { %1616 = vmatpush1.bf16.msra.mxu1 %v1519_v34 }
 0x166   : > { %v1210_v42 = vpop.permute.xlu1 %1209  ;;  %v1208_v43 = vpop.permute.xlu0 %1207 }
 0x167   : > { %v1212_v44 = vsel %vm1211_vm2, %v1208_v43, %v1210_v42  ;;  %v1213_v45 = vsel %vm1211_vm2, %v1210_v42, %v1208_v43  ;;  %v1311_v42 = vld [vmem:[#allocation6 + $0x5a] sm:$0x3] }
 0x168   : > { %v1227_v50 = vmul.f32 %v1220_v37, %v1212_v44  ;;  %v1228_v51 = vmul.f32 %v1224_v38, %v1213_v45 }
 0x16a   : > { %v826_v52 = vpop.permute.xlu1 %825  ;;  %v824_v53 = vpop.permute.xlu0 %823  ;;  %v1538_v54 = vpack.c.bf16 %v1228_v51, %v1204_v49  ;;  %v1537_v55 = vpack.c.bf16 %v1227_v50, %v1203_v48  ;;  %v1296_v48 = vrot.slane %v1287_v41, %v2461_v6  ;;  %v1316_v49 = vrot.slane %v1311_v42, %v2459_v5 }
 0x16b   : > { %v828_v56 = vsel %vm827_vm3, %v824_v53, %v826_v52  ;;  %v829_v57 = vsel %vm827_vm3, %v826_v52, %v824_v53  ;;  %v1320_v50 = vrot.slane %v1311_v42, %v2461_v6 }
 0x16c   : > { %v843_v58 = vmul.f32 %v836_v46, %v828_v56  ;;  %v844_v59 = vmul.f32 %v840_v47, %v829_v57  ;;  %1644 = vmatprep.subr.bf16.mxu0 %v1538_v54  ;;  %v1292_v47 = vrot.slane %v1287_v41, %v2459_v5  ;;  %v975_v41 = vld [vmem:[#allocation6 + $0x3e] sm:$0x3] }
 0x16d   : > { %1645 = vmatpush1.bf16.msra.mxu0 %v1537_v55 }
 0x16e   : > { %v1234_v62 = vpop.permute.xlu1 %1233  ;;  %v1232_v63 = vpop.permute.xlu0 %1231  ;;  %v1522_v3 = vpack.c.bf16 %v844_v59, %v1956_v2  ;;  %v1521_v8 = vpack.c.bf16 %v843_v58, %v1957_v7 }
 0x16f   : > { %v1236_v13 = vsel %vm1235_vm4, %v1232_v63, %v1234_v62  ;;  %v1237_v14 = vsel %vm1235_vm4, %v1234_v62, %v1232_v63  ;;  %v927_v62 = vld [vmem:[#allocation6 + $0x3a] sm:$0x3] }
 0x170   : > { %1617 = vmatprep.subr.bf16.mxu1 %v1522_v3  ;;  %v1251_v19 = vmul.f32 %v1244_v9, %v1236_v13  ;;  %v1252_v20 = vmul.f32 %v1248_v10, %v1237_v14  ;;  %v912_v9 = vrot.slane %v903_v61, %v2461_v6  ;;  %v932_v10 = vrot.slane %v927_v62, %v2459_v5 }
 0x171   : > { %1618 = vmatpush1.bf16.msra.mxu1 %v1521_v8  ;;  %v908_v8 = vrot.slane %v903_v61, %v2459_v5 }
 0x172   : > { %v1258_v15 = vpop.permute.xlu1 %1257  ;;  %v1256_v16 = vpop.permute.xlu0 %1255 }
 0x173   : > { %v1260_v17 = vsel %vm1259_vm5, %v1256_v16, %v1258_v15  ;;  %v1261_v18 = vsel %vm1259_vm5, %v1258_v15, %v1256_v16 }
 0x174   : > { %v1275_v21 = vmul.f32 %v1268_v11, %v1260_v17  ;;  %v1276_v22 = vmul.f32 %v1272_v12, %v1261_v18  ;;  %v936_v11 = vrot.slane %v927_v62, %v2461_v6 }
 0x176   : > { %v850_v0 = vpop.permute.xlu1 %849  ;;  %v848_v24 = vpop.permute.xlu0 %847  ;;  %v1540_v25 = vpack.c.bf16 %v1276_v22, %v1252_v20  ;;  %v1539_v26 = vpack.c.bf16 %v1275_v21, %v1251_v19  ;;  %v1335_v22 = vld [vmem:[#allocation6 + $0x5c] sm:$0x3] }
 0x177   : > { %v852_v31 = vsel %vm851_vm6, %v848_v24, %v850_v0  ;;  %v853_v32 = vsel %vm851_vm6, %v850_v0, %v848_v24 }
 0x178   : > { %1646 = vmatprep.subr.bf16.mxu0 %v1540_v25  ;;  %v867_v37 = vmul.f32 %v860_v27, %v852_v31  ;;  %v868_v38 = vmul.f32 %v864_v28, %v853_v32  ;;  %v1344_v27 = vrot.slane %v1335_v22, %v2461_v6  ;;  %v1364_v28 = vrot.slane %v1359_v23, %v2459_v5 }
 0x179   : > { %1647 = vmatpush1.bf16.msra.mxu0 %v1539_v26  ;;  %v1340_v26 = vrot.slane %v1335_v22, %v2459_v5 }
 0x17a   : > { %v874_v33 = vpop.permute.xlu1 %873  ;;  %v872_v34 = vpop.permute.xlu0 %871 }
 0x17b   : > { %v876_v35 = vsel %vm875_vm7, %v872_v34, %v874_v33  ;;  %v877_v36 = vsel %vm875_vm7, %v874_v33, %v872_v34 }
 0x17c   : > { %v891_v39 = vmul.f32 %v884_v29, %v876_v35  ;;  %v892_v40 = vmul.f32 %v888_v30, %v877_v36  ;;  %v1368_v29 = vrot.slane %v1359_v23, %v2461_v6 }
 0x17e   : > { %v1282_v43 = vpop.permute.xlu1 %1281  ;;  %v1280_v44 = vpop.permute.xlu0 %1279  ;;  %v1524_v45 = vpack.c.bf16 %v892_v40, %v868_v38  ;;  %v1523_v46 = vpack.c.bf16 %v891_v39, %v867_v37  ;;  %v951_v40 = vld [vmem:[#allocation6 + $0x3c] sm:$0x3] }
 0x17f   : > { %v1284_v51 = vsel %vm1283_vm8, %v1280_v44, %v1282_v43  ;;  %v1285_v52 = vsel %vm1283_vm8, %v1282_v43, %v1280_v44 }
 0x180   : > { %1619 = vmatprep.subr.bf16.mxu1 %v1524_v45  ;;  %v1299_v57 = vmul.f32 %v1292_v47, %v1284_v51  ;;  %v1300_v58 = vmul.f32 %v1296_v48, %v1285_v52  ;;  %v960_v47 = vrot.slane %v951_v40, %v2461_v6  ;;  %v980_v48 = vrot.slane %v975_v41, %v2459_v5 }
 0x181   : > { %1620 = vmatpush1.bf16.msra.mxu1 %v1523_v46  ;;  %v956_v46 = vrot.slane %v951_v40, %v2459_v5 }
 0x182   : > { %v1306_v53 = vpop.permute.xlu1 %1305  ;;  %v1304_v54 = vpop.permute.xlu0 %1303 }
 0x183   : > { %v1308_v55 = vsel %vm1307_vm9, %v1304_v54, %v1306_v53  ;;  %v1309_v56 = vsel %vm1307_vm9, %v1306_v53, %v1304_v54 }
 0x184   : > { %v1323_v59 = vmul.f32 %v1316_v49, %v1308_v55  ;;  %v1324_v60 = vmul.f32 %v1320_v50, %v1309_v56  ;;  %v984_v49 = vrot.slane %v975_v41, %v2461_v6  ;;  %v1383_v50 = vld [vmem:[#allocation6 + $0x60] sm:$0x3] }
 0x186   : > { %v898_v63 = vpop.permute.xlu1 %897  ;;  %v896_v2 = vpop.permute.xlu0 %895  ;;  %v1542_v3 = vpack.c.bf16 %v1324_v60, %v1300_v58  ;;  %v1541_v7 = vpack.c.bf16 %v1323_v59, %v1299_v57  ;;  %v1388_v57 = vrot.slane %v1383_v50, %v2459_v5  ;;  %v1392_v58 = vrot.slane %v1383_v50, %v2461_v6 }
 0x187   : > { %v900_v12 = vsel %vm899_vm10, %v896_v2, %v898_v63  ;;  %v901_v13 = vsel %vm899_vm10, %v898_v63, %v896_v2 }
 0x188   : > { %1648 = vmatprep.subr.bf16.mxu0 %v1542_v3  ;;  %v915_v18 = vmul.f32 %v908_v8, %v900_v12  ;;  %v916_v19 = vmul.f32 %v912_v9, %v901_v13  ;;  %v1953_v13 = vld [vmem:[#allocation3 + $0x8] ss:$16 sps:$4 sm:$0xff]  }
 0x189   : > { %1649 = vmatpush1.bf16.msra.mxu0 %v1541_v7 }
 0x18a   : > { %v922_v14 = vpop.permute.xlu1 %921  ;;  %v920_v15 = vpop.permute.xlu0 %919 }
 0x18b   : > { %v924_v16 = vsel %vm923_vm11, %v920_v15, %v922_v14  ;;  %v925_v17 = vsel %vm923_vm11, %v922_v14, %v920_v15 }
 0x18c   : > { %v939_v20 = vmul.f32 %v932_v10, %v924_v16  ;;  %v940_v21 = vmul.f32 %v936_v11, %v925_v17 }
 0x18e   : > { %v1330_v1 = vpop.permute.xlu1 %1329  ;;  %v1328_v0 = vpop.permute.xlu0 %1327  ;;  %v1526_v24 = vpack.c.bf16 %v940_v21, %v916_v19  ;;  %v1525_v25 = vpack.c.bf16 %v939_v20, %v915_v18 }
 0x18f   : > { %v1332_v30 = vsel %vm1331_vm12, %v1328_v0, %v1330_v1  ;;  %v1333_v31 = vsel %vm1331_vm12, %v1330_v1, %v1328_v0 }
 0x190   : > { %1621 = vmatprep.subr.bf16.mxu1 %v1526_v24  ;;  %v1347_v36 = vmul.f32 %v1340_v26, %v1332_v30  ;;  %v1348_v37 = vmul.f32 %v1344_v27, %v1333_v31 }
 0x191   : > { %1622 = vmatpush1.bf16.msra.mxu1 %v1525_v25 }
 0x192   : > { %v1354_v32 = vpop.permute.xlu1 %1353  ;;  %v1352_v33 = vpop.permute.xlu0 %1351 }
 0x193   : > { %v1356_v34 = vsel %vm1355_vm13, %v1352_v33, %v1354_v32  ;;  %v1357_v35 = vsel %vm1355_vm13, %v1354_v32, %v1352_v33 }
 0x194   : > { %v1371_v38 = vmul.f32 %v1364_v28, %v1356_v34  ;;  %v1372_v39 = vmul.f32 %v1368_v29, %v1357_v35 }
 0x196   : > { %v946_v42 = vpop.permute.xlu1 %945  ;;  %v944_v43 = vpop.permute.xlu0 %943  ;;  %v1544_v44 = vpack.c.bf16 %v1372_v39, %v1348_v37  ;;  %v1543_v45 = vpack.c.bf16 %v1371_v38, %v1347_v36 }
 0x197   : > { %v948_v51 = vsel %vm947_vm14, %v944_v43, %v946_v42  ;;  %v949_v52 = vsel %vm947_vm14, %v946_v42, %v944_v43 }
 0x198   : > { %1650 = vmatprep.subr.bf16.mxu0 %v1544_v44  ;;  %v963_v59 = vmul.f32 %v956_v46, %v948_v51  ;;  %v964_v60 = vmul.f32 %v960_v47, %v949_v52 }
 0x199   : > { %1651 = vmatpush1.bf16.msra.mxu0 %v1543_v45 }
 0x19a   : > { %v970_v53 = vpop.permute.xlu1 %969  ;;  %v968_v54 = vpop.permute.xlu0 %967 }
 0x19b   : > { %v972_v55 = vsel %vm971_vm15, %v968_v54, %v970_v53  ;;  %v973_v56 = vsel %vm971_vm15, %v970_v53, %v968_v54 }
 0x19c   : > { %v987_v61 = vmul.f32 %v980_v48, %v972_v55  ;;  %v988_v62 = vmul.f32 %v984_v49, %v973_v56 }
 0x19e   : > { %v1378_v63 = vpop.permute.xlu1 %1377  ;;  %v1376_v2 = vpop.permute.xlu0 %1375  ;;  %v1528_v3 = vpack.c.bf16 %v988_v62, %v964_v60  ;;  %v1527_v7 = vpack.c.bf16 %v987_v61, %v963_v59 }
 0x19f   : > { %v1380_v8 = vsel %vm1379_vm0, %v1376_v2, %v1378_v63  ;;  %v1381_v9 = vsel %vm1379_vm0, %v1378_v63, %v1376_v2 }
 0x1a0   : > { %v1395_v10 = vmul.f32 %v1388_v57, %v1380_v8  ;;  %v1396_v11 = vmul.f32 %v1392_v58, %v1381_v9  ;;  %1623 = vmatprep.subr.bf16.mxu1 %v1528_v3 }
 0x1a1   : > { %1624 = vmatpush1.bf16.msra.mxu1 %v1527_v7 }
 0x1a2   : > { %v1545_v5 = vpack.c.bf16 %v1395_v10, %v1395_v10  ;;  %v1546_v12 = vpack.c.bf16 %v1396_v11, %v1396_v11 }
 0x1a4   : > { %1626 = vmatmul.mubr.bf16.vlgmr.msra.gmra.mrb[0].mxu1 %v1950_v4  ;;  %1810 = vmatprep.subr.msk.bf16.mxu0 %vm1586_vm1, %v1546_v12  ;;  %v1588_v6 = vsel %vm1586_vm1, %v1545_v5, 0 }
 0x1a5   : > { %1653 = vmatpush1.bf16.msra.mxu0 %v1588_v6 }
 0x1a8   : > { %1669 = vmatmul.mubr.bf16.vlgmr.msra.gmra.mrb[0].mxu0 %v1953_v13 }
 0x1af   : > { %v1556_v14 = vpop.permute.xlu0 %1555  ;;  %v1561_v18 = vpop.permute.xlu1 %1560 }
 0x277   : > { %v1627_v15 = vpop.f32.mrb[0].mxu1 }
 0x278   : > { %v1629_v16 = vpop.f32.mrb[1].mxu1  ;;  %v1628_v17 = vadd.f32 %v1627_v15, %v1556_v14 }
 0x279   : > { %v1631_v19 = vpop.f32.mrb[2].mxu1  ;;  %v1630_v20 = vadd.f32 %v1629_v16, %v1556_v14 }
 0x27a   : > { %v1633_v21 = vpop.f32.mrb[3].mxu1  ;;  %v1632_v23 = vadd.f32 %v1631_v19, %v1561_v18 }
 0x27b   : > { %v1670_v22 = vpop.f32.mrb[0].mxu0  ;;  %v1634_v24 = vadd.f32 %v1633_v21, %v1561_v18 }
 0x27c   : > { %v1671_v1 = vadd.f32 %v1670_v22, %v1628_v17  ;;  %v1672_v0 = vpop.f32.mrb[1].mxu0 }
 0x27d   : > { %v1673_v25 = vadd.f32 %v1672_v0, %v1630_v20  ;;  %v1674_v26 = vpop.f32.mrb[2].mxu0 }
 0x27e   : > { %v1679_v27 = vmax.f32 %v1671_v1, 0.0  ;;  %v1675_v28 = vadd.f32 %v1674_v26, %v1632_v23  ;;  %v1676_v29 = vpop.f32.mrb[3].mxu0 }
 0x27f   : > { %v1680_v30 = vmax.f32 %v1673_v25, 0.0  ;;  %v1677_v31 = vadd.f32 %v1676_v29, %v1634_v24 }
 0x280   : > { %1683 = vst [vmem:[%s240_s27] sm:$0xff] %v1679_v27  ;;  %v1681_v32 = vmax.f32 %v1675_v28, 0.0 }
 0x281   : > { %1684 = vst [vmem:[%s240_s27 + $0x8] sm:$0xff] %v1680_v30  ;;  %v1682_v33 = vmax.f32 %v1677_v31, 0.0 }
 0x282   : > { %1685 = vst [vmem:[%s240_s27 + $0x10] sm:$0xff] %v1681_v32 }
 0x283   : > { %1686 = vst [vmem:[%s240_s27 + $0x18] sm:$0xff] %v1682_v33 }
 0x284   : > { %2057 = shalt.err (!%p2054_p6)
}
 0x285   : > { %s2058_s13 = scalar_lea.hbm %s2672_s25, 512  ;;  %s2062_s26 = scalar_lea.hbm %s2721_s4, 1024 }
 0x286   : > { %p2059_p10 = scmp.ne.s32.totalorder %s2672_s25, %s2058_s13  ;;  %p2063_p3 = scmp.lt.u32.totalorder %s2672_s25, %s2721_s4 }
 0x287   : > { %p2064_p4 = scmp.lt.u32.totalorder %s2062_s26, %s2058_s13  ;;  %p2066_p7 = scmp.lt.u32.totalorder %s2058_s13, %s2672_s25 }
 0x288   : > { %p2060_p0 = pnand %p2059_p10, %p2737_p11 }
 0x289   : > { %p2065_p8 = por %p2064_p4, %p2063_p3 }
 0x28a   : > { %p2061_p1 = pneg %p2060_p0 }
 0x28b   : > { %p2067_p5 = por %p2066_p7, %p2065_p8 }
 0x28d   : > { %p2068_p9 = pnand %p2067_p5, %p2061_p1 }
 0x28f   : > { %2071 = shalt.err (!%p2068_p9)
}
 0x290   : > { %s2177_s30 = smov 256  }
 0x291   : > { %1837 = dma.vmem_to_hbm [thread:$0]  (%p2737_p11), %s2667_s29, 512, %s2672_s25, %s1688_s8, %s2177_s30, %s2177_s30, %s2146_s12  }
 0x292 PF: > { %s1716_s6 = sand.u32 1, %s2106_s15   ;;  %p2738_p12 = scmp.ne.s32.totalorder %s2726_s22, 0 }
 0x293   : > { %p2739_p2 = scmp.ge.s32.totalorder %s2118_s18, 2  ;;  %s1717_s23 = scalar_lea.sflag [#allocation5], %s1716_s6 }
 0x295   : > { %p1851_p13 = pnand %p2739_p2, %p2738_p12 }
 0x297   : > { %2101 = dma.done.wait (!%p1851_p13), %s1717_s23, 512  }
 0x298   : > { %2103 = vsyncadd (!%p1851_p13), %s1717_s23, 4294966784  ;;  %p16_p6 = scmp.ge.s32.totalorder %s2313_s11, 4   ;;  %s2740_s15 = smov %s2110_s16 }
 0x299   : > { %s2741_s16 = smov %s2114_s17  ;;  %s2742_s17 = smov %s2322_s14 }
 0x29a   : > { %s2743_s18 = smov %s2313_s11  ;;  %18 = sbr.rel (!%p16_p6) target bundleno = 5 (0x5), region = 135 }
 0x2a1   :  { %1722 = vsyncpa [#allocation4], 1 }
 0x2a2   :  { %1724 = vsyncpa [#allocation4 + $0x1], 1 }
 0x2a3   :  { %1725 = vsyncpa [#allocation7], 1 }
 0x2a4   :  { %1726 = vsyncpa [#allocation5], 1 }
 0x2a5   :  { %1728 = vsyncpa [#allocation5 + $0x1], 1 }

</bundles_post_ra>
